<compile_context>
chip_gen: v7x
topology: tpu7x:2x2x1
jax: 0.10.0
libtpu: 0.0.40
codegen_flags: <defaults>
</compile_context>

<pallas_src>
import functools

import jax
import jax.numpy as jnp
from jax.experimental import pallas as pl
from jax.experimental.pallas import tpu as pltpu

EEG_FREQUENCY = 8          # stand-in for Config.EEG_FREQUENCY
VMEM_LIMIT = 32 * 1024 * 1024   # safe on v5e/v6e/v7x scoped-VMEM budgets


def _round_up(x, m):
    return ((x + m - 1) // m) * m


# ----------------------------------------------------------------------------
# Tiled (A @ B + bias) [+ ReLU] kernel (bf16 operands, f32 accumulation).
# Used for the im2col conv.
# ----------------------------------------------------------------------------
def _mm_bias_kernel(a_ref, b_ref, bias_ref, o_ref, *, activation):
    acc = jnp.dot(a_ref[...], b_ref[...], preferred_element_type=jnp.float32)
    acc = acc + bias_ref[...]
    if activation == "relu":
        acc = jnp.maximum(acc, 0.0)
    o_ref[...] = acc.astype(o_ref.dtype)


def matmul_bias(a, b, bias, activation=None, out_dtype=jnp.float32, tile_m=512):
    M, K = a.shape
    K2, N = b.shape
    assert K == K2
    a16 = a.astype(jnp.bfloat16)
    b16 = b.astype(jnp.bfloat16)
    bias2 = jnp.asarray(bias, jnp.float32).reshape(1, N)

    tm = min(tile_m, _round_up(M, 16))          # 16-row granularity for bf16 tiles
    M_pad = _round_up(M, tm)
    if M_pad != M:
        a16 = jnp.pad(a16, ((0, M_pad - M), (0, 0)))

    out = pl.pallas_call(
        functools.partial(_mm_bias_kernel, activation=activation),
        out_shape=jax.ShapeDtypeStruct((M_pad, N), out_dtype),
        grid=(M_pad // tm,),
        in_specs=[
            pl.BlockSpec((tm, K), lambda i: (i, 0)),
            pl.BlockSpec((K, N), lambda i: (0, 0)),
            pl.BlockSpec((1, N), lambda i: (0, 0)),
        ],
        out_specs=pl.BlockSpec((tm, N), lambda i: (i, 0)),
        compiler_params=pltpu.CompilerParams(
            dimension_semantics=("parallel",),
            vmem_limit_bytes=VMEM_LIMIT),
    )(a16, b16, bias2)
    return out[:M]


# ----------------------------------------------------------------------------
# SpatAttLayer kernel: one grid step = a block of GB (sample, timestep) graphs.
# All heads' W_att projections are done in one matmul (H -> heads*H); the
# attention score vectors a_l/a_r are pre-folded into (H, heads) so el/er come
# from a single small matmul on h; gate and proj share one (H, 2H) matmul.
# ----------------------------------------------------------------------------
def _spat_att_kernel(h_ref, w_all_ref, alr_ref, w_gp_ref, b_gp_ref, o_ref, *,
                     num_heads, hidden, gb, nn):
    h = h_ref[...]                                   # (GB, NN, H) bf16
    hs = h.reshape(gb * nn, hidden)

    # merged per-head projection and attention score vectors
    wh_all = jnp.dot(hs, w_all_ref[...],
                     preferred_element_type=jnp.float32)   # (GB*NN, heads*H)
    elr = jnp.dot(hs, alr_ref[...],
                  preferred_element_type=jnp.float32)       # (GB*NN, 2*heads)
    elr3 = elr.reshape(gb, nn, 2 * num_heads)

    acc = jnp.zeros((gb, nn, hidden), jnp.float32)
    for hd in range(num_heads):                      # heads is tiny & static
        el = elr3[:, :, hd][:, :, None]              # (GB, NN, 1)
        er = elr3[:, :, num_heads + hd][:, None, :]  # (GB, 1, NN)
        e = el + er                                  # (GB, NN, NN)
        e = jnp.where(e > 0, e, 0.2 * e)             # LeakyReLU(0.2), f32
        e = e - jnp.max(e, axis=-1, keepdims=True)
        p = jnp.exp(e)
        denom = jnp.sum(p, axis=-1, keepdims=True)
        alpha = p * pl.reciprocal(denom, approx=True)    # softmax over nodes
        wh = wh_all[:, hd * hidden:(hd + 1) * hidden].reshape(gb, nn, hidden)
        acc = acc + jnp.einsum("gij,gjh->gih",
                               alpha.astype(jnp.bfloat16),
                               wh.astype(jnp.bfloat16),
                               preferred_element_type=jnp.float32)
    acc = acc * (1.0 / num_heads)                    # merge='mean'

    # sigmoid-gated projection (gate & proj merged into one matmul)
    gp = jnp.dot(hs, w_gp_ref[...],
                 preferred_element_type=jnp.float32) + b_gp_ref[...]
    gate = jax.nn.sigmoid(gp[:, :hidden])
    proj = gp[:, hidden:]
    gated = (gate * proj).reshape(gb, nn, hidden)

    o_ref[...] = jnp.concatenate([gated, acc], axis=-1).astype(o_ref.dtype)


def spat_att_layer(h_all, w_all, alr, w_gp, b_gp, *, num_heads, hidden,
                   graphs_per_block=16):
    G, NN, H = h_all.shape
    gb = min(graphs_per_block, G)
    G_pad = _round_up(G, gb)
    if G_pad != G:
        h_all = jnp.pad(h_all, ((0, G_pad - G), (0, 0), (0, 0)))

    out = pl.pallas_call(
        functools.partial(_spat_att_kernel, num_heads=num_heads,
                          hidden=hidden, gb=gb, nn=NN),
        out_shape=jax.ShapeDtypeStruct((G_pad, NN, 2 * H), jnp.float32),
        grid=(G_pad // gb,),
        in_specs=[
            pl.BlockSpec((gb, NN, H), lambda i: (i, 0, 0)),
            pl.BlockSpec((H, num_heads * H), lambda i: (0, 0)),
            pl.BlockSpec((H, 2 * num_heads), lambda i: (0, 0)),
            pl.BlockSpec((H, 2 * H), lambda i: (0, 0)),
            pl.BlockSpec((1, 2 * H), lambda i: (0, 0)),
        ],
        out_specs=pl.BlockSpec((gb, NN, 2 * H), lambda i: (i, 0, 0)),
        compiler_params=pltpu.CompilerParams(
            dimension_semantics=("parallel",),
            vmem_limit_bytes=VMEM_LIMIT),
    )(h_all.astype(jnp.bfloat16), w_all.astype(jnp.bfloat16),
      alr.astype(jnp.bfloat16), w_gp.astype(jnp.bfloat16),
      b_gp.astype(jnp.float32))
    return out[:G]


# ----------------------------------------------------------------------------
# Fused linear_time (Linear stT -> 1 over time) + ReLU + TranLayer (2H -> 1).
# Pure VPU/XLU kernel: 2H stays on lanes, the time reduction is a scalar-
# weighted accumulate, the head is a lane reduction.  Replaces two width-1
# matmul launches and the activation transpose of the previous version.
# ----------------------------------------------------------------------------
def _time_tran_kernel(x_ref, wt_ref, wtr_ref, b_ref, o_ref, *, stT):
    x = x_ref[...]                                   # (BB, stT, NN, H2) f32
    acc = x[:, 0, :, :] * wt_ref[0]
    for t in range(1, stT):
        acc = acc + x[:, t, :, :] * wt_ref[t]
    agg = jnp.maximum(acc + b_ref[0], 0.0)           # (BB, NN, H2), ReLU
    wtr = wtr_ref[...].reshape(1, 1, -1)             # (1, 1, H2)
    pred = jnp.sum(agg * wtr, axis=-1, keepdims=True) + b_ref[1]  # (BB, NN, 1)
    o_ref[...] = pred.astype(o_ref.dtype)


def time_tran(spat4, w_time, b_time, w_tran, b_tran, *, block_b=8):
    B, stT, NN, H2 = spat4.shape
    bb = min(block_b, B)
    B_pad = _round_up(B, bb)
    if B_pad != B:
        spat4 = jnp.pad(spat4, ((0, B_pad - B), (0, 0), (0, 0), (0, 0)))

    w_time_s = jnp.asarray(w_time, jnp.float32).reshape(stT)
    bias_s = jnp.stack([jnp.asarray(b_time, jnp.float32).reshape(()),
                        jnp.asarray(b_tran, jnp.float32).reshape(())])
    w_tran2 = jnp.asarray(w_tran, jnp.float32).reshape(1, H2)

    out = pl.pallas_call(
        functools.partial(_time_tran_kernel, stT=stT),
        out_shape=jax.ShapeDtypeStruct((B_pad, NN, 1), jnp.float32),
        grid=(B_pad // bb,),
        in_specs=[
            pl.BlockSpec((bb, stT, NN, H2), lambda i: (i, 0, 0, 0)),
            pl.BlockSpec(memory_space=pltpu.MemorySpace.SMEM),
            pl.BlockSpec((1, H2), lambda i: (0, 0)),
            pl.BlockSpec(memory_space=pltpu.MemorySpace.SMEM),
        ],
        out_specs=pl.BlockSpec((bb, NN, 1), lambda i: (i, 0, 0)),
        compiler_params=pltpu.CompilerParams(
            dimension_semantics=("parallel",),
            vmem_limit_bytes=VMEM_LIMIT),
    )(spat4, w_time_s, w_tran2, bias_s)
    return out[:B]


# ----------------------------------------------------------------------------
# Full BAPM2 forward.
# ----------------------------------------------------------------------------
def bapm2_forward(feat, params, *, batch, num_nodes, feat_dim, hidden, num_heads,
                  stride, num_timestamps):
    K = EEG_FREQUENCY
    stT = (num_timestamps - K) // stride + 1
    H2 = 2 * hidden
    NN = num_nodes

    # ---- StCNN: Conv1d via im2col built directly in (sample, t, node) order ----
    # TODO(synk): fold the strided window gather into the conv pallas_call
    # (pl.ds strided reads of feat) to avoid the K/stride-fold input duplication.
    feat_r = feat.reshape(batch, NN, feat_dim, num_timestamps)
    t_idx = jnp.arange(stT)[:, None] * stride + jnp.arange(K)[None, :]   # (stT, K)
    patches = feat_r[:, :, :, t_idx]                       # (B, NN, F, stT, K)
    patches = jnp.transpose(patches, (0, 3, 1, 2, 4))      # (B, stT, NN, F, K)
    patches = patches.reshape(batch * stT * NN, feat_dim * K)
    w_conv = params["w_conv"].reshape(hidden, feat_dim * K).T            # (F*K, H)
    conv = matmul_bias(patches, w_conv, params["b_conv"], activation="relu",
                       out_dtype=jnp.bfloat16)
    h_all = conv.reshape(batch * stT, NN, hidden)          # graph-major, no transpose

    # ---- SpatAttLayer: pack per-head weights into single wide matrices ----
    w_att, a_l, a_r = params["w_att"], params["a_l"], params["a_r"]
    W_all = jnp.transpose(w_att, (1, 0, 2)).reshape(hidden, num_heads * hidden)
    al_c = jnp.einsum("nij,nj->in", w_att, a_l[..., 0])    # (H, heads) = W_hd @ a_l_hd
    ar_c = jnp.einsum("nij,nj->in", w_att, a_r[..., 0])
    ALR = jnp.concatenate([al_c, ar_c], axis=1)            # (H, 2*heads)
    W_gp = jnp.concatenate([params["w_gate"], params["w_proj"]], axis=1)  # (H, 2H)
    b_gp = jnp.concatenate([params["b_gate"].reshape(1, hidden),
                            jnp.zeros((1, hidden), jnp.float32)], axis=1)

    spat = spat_att_layer(h_all, W_all, ALR, W_gp, b_gp,
                          num_heads=num_heads, hidden=hidden)  # (B*stT, NN, 2H) f32

    # ---- fused linear_time(stT -> 1) + ReLU + TranLayer(2H -> 1) ----
    # TODO(synk): TranLayer source unavailable; implemented as a per-node linear.
    spat4 = spat.reshape(batch, stT, NN, H2)
    pred = time_tran(spat4, params["w_time"], params["b_time"],
                     params["w_tran"], params["b_tran"])
    return pred                                            # (batch, NN, 1)


def init_params(key, *, feat_dim, hidden, num_heads):
    K = EEG_FREQUENCY
    keys = jax.random.split(key, 10)
    s = 0.1
    return {
        "w_conv": s * jax.random.normal(keys[0], (hidden, feat_dim, K), jnp.float32),
        "b_conv": s * jax.random.normal(keys[1], (hidden,), jnp.float32),
        "w_att": s * jax.random.normal(keys[2], (num_heads, hidden, hidden), jnp.float32),
        "a_l": s * jax.random.normal(keys[3], (num_heads, hidden, 1), jnp.float32),
        "a_r": s * jax.random.normal(keys[4], (num_heads, hidden, 1), jnp.float32),
        "w_gate": s * jax.random.normal(keys[5], (hidden, hidden), jnp.float32),
        "b_gate": jnp.zeros((1, hidden), jnp.float32),
        "w_proj": s * jax.random.normal(keys[6], (hidden, hidden), jnp.float32),
        "w_time": None,   # filled below (needs stT)
        "b_time": jnp.zeros((1,), jnp.float32),
        "w_tran": s * jax.random.normal(keys[7], (2 * hidden, 1), jnp.float32),
        "b_tran": jnp.zeros((1,), jnp.float32),
        "_key_time": keys[8],
    }


if __name__ == "__main__":
    # Small deterministic configuration.
    batch = 2
    num_nodes = 8
    feat_dim = 4
    hidden_dim = 32
    num_heads = 2
    stride = 2
    num_timestamps = 16
    stT = (num_timestamps - EEG_FREQUENCY) // stride + 1

    key = jax.random.PRNGKey(0)
    k_feat, k_param = jax.random.split(key)

    # dgl node features g.ndata['v']: (batch*num_nodes, feat_dim, num_timestamps)
    feat = jax.random.normal(k_feat, (batch * num_nodes, feat_dim, num_timestamps),
                             jnp.float32)

    params = init_params(k_param, feat_dim=feat_dim, hidden=hidden_dim,
                         num_heads=num_heads)
    params["w_time"] = 0.1 * jax.random.normal(params.pop("_key_time"),
                                               (stT,), jnp.float32)

    fwd = jax.jit(functools.partial(
        bapm2_forward, batch=batch, num_nodes=num_nodes, feat_dim=feat_dim,
        hidden=hidden_dim, num_heads=num_heads, stride=stride,
        num_timestamps=num_timestamps))
    pred = fwd(feat, params)
    pred = jax.block_until_ready(pred)
    assert pred.shape == (batch, num_nodes, 1)
    print("KERNEL_OK")
</pallas_src>

<mosaic_0001>
module attributes {stable_mosaic.version = 11 : i64} {
  func.func @_mm_bias_kernel(%arg0: i32, %arg1: memref<80x32xbf16, #tpu.memory_space<vmem>>, %arg2: memref<32x32xbf16, #tpu.memory_space<vmem>>, %arg3: memref<1x32xf32, #tpu.memory_space<vmem>>, %arg4: memref<80x32xbf16, #tpu.memory_space<vmem>>) attributes {dimension_semantics = [#tpu.dimension_semantics<parallel>], iteration_bounds = array<i64: 1>, scalar_prefetch = 0 : i64, scratch_operands = 0 : i64, tpu.core_type = #tpu.core_type<tc>, window_params = [{transform_indices = @transform_0, window_bounds = array<i64: 80, 32>}, {pipeline_mode = #tpu.pipeline_mode<synchronous>, transform_indices = @transform_1, window_bounds = array<i64: 32, 32>}, {pipeline_mode = #tpu.pipeline_mode<synchronous>, transform_indices = @transform_2, window_bounds = array<i64: 1, 32>}, {transform_indices = @transform_3, window_bounds = array<i64: 80, 32>}]} {
    %c0 = arith.constant 0 : index
    %c0_0 = arith.constant 0 : index
    %0 = vector.load %arg1[%c0, %c0_0] : memref<80x32xbf16, #tpu.memory_space<vmem>>, vector<80x32xbf16>
    %c0_1 = arith.constant 0 : index
    %c0_2 = arith.constant 0 : index
    %1 = vector.load %arg2[%c0_1, %c0_2] : memref<32x32xbf16, #tpu.memory_space<vmem>>, vector<32x32xbf16>
    %cst = arith.constant dense<0.000000e+00> : vector<80x32xf32>
    %2 = tpu.matmul %0, %1, %cst {dimension_numbers = #tpu.dot_dimension_numbers<[1], [0], [0], [1], [0, 0, 1, 1], [], []>} : vector<80x32xbf16>, vector<32x32xbf16>, vector<80x32xf32> -> vector<80x32xf32>
    %c0_3 = arith.constant 0 : index
    %c0_4 = arith.constant 0 : index
    %3 = vector.load %arg3[%c0_3, %c0_4] : memref<1x32xf32, #tpu.memory_space<vmem>>, vector<1x32xf32>
    %4 = vector.broadcast %3 : vector<1x32xf32> to vector<80x32xf32>
    %5 = arith.addf %2, %4 : vector<80x32xf32>
    %cst_5 = arith.constant 0.000000e+00 : f32
    %6 = vector.broadcast %cst_5 : f32 to vector<80x32xf32>
    %7 = arith.maximumf %5, %6 : vector<80x32xf32>
    %8 = arith.truncf %7 : vector<80x32xf32> to vector<80x32xbf16>
    %c0_6 = arith.constant 0 : index
    %c0_7 = arith.constant 0 : index
    %9 = vector.load %arg4[%c0_6, %c0_7] : memref<80x32xbf16, #tpu.memory_space<vmem>>, vector<80x32xbf16>
    tpu.vector_store %arg4[%c0_6, %c0_7], %8 {strides = array<i32>} : memref<80x32xbf16, #tpu.memory_space<vmem>>, vector<80x32xbf16>,
    return
  }
  func.func @transform_0(%arg0: i32) -> (i32, i32) {
    %c0_i32 = arith.constant 0 : i32
    %c0_i32_0 = arith.constant 0 : i32
    return %arg0, %c0_i32 : i32, i32
  }
  func.func @transform_1(%arg0: i32) -> (i32, i32) {
    %c0_i32 = arith.constant 0 : i32
    %c0_i32_0 = arith.constant 0 : i32
    %c0_i32_1 = arith.constant 0 : i32
    return %c0_i32, %c0_i32_0 : i32, i32
  }
  func.func @transform_2(%arg0: i32) -> (i32, i32) {
    %c0_i32 = arith.constant 0 : i32
    %c0_i32_0 = arith.constant 0 : i32
    %c0_i32_1 = arith.constant 0 : i32
    return %c0_i32, %c0_i32_0 : i32, i32
  }
  func.func @transform_3(%arg0: i32) -> (i32, i32) {
    %c0_i32 = arith.constant 0 : i32
    %c0_i32_0 = arith.constant 0 : i32
    return %arg0, %c0_i32 : i32, i32
  }
}

module attributes {stable_mosaic.version = 11 : i64} {
  func.func @_time_tran_kernel(%arg0: i32, %arg1: memref<2x5x8x64xf32, #tpu.memory_space<vmem>>, %arg2: memref<5xf32, #tpu.memory_space<smem>>, %arg3: memref<1x64xf32, #tpu.memory_space<vmem>>, %arg4: memref<2xf32, #tpu.memory_space<smem>>, %arg5: memref<2x8x1xf32, #tpu.memory_space<vmem>>) attributes {dimension_semantics = [#tpu.dimension_semantics<parallel>], iteration_bounds = array<i64: 1>, scalar_prefetch = 0 : i64, scratch_operands = 0 : i64, tpu.core_type = #tpu.core_type<tc>, window_params = [{transform_indices = @transform_0, window_bounds = array<i64: 2, 5, 8, 64>}, {transform_indices = @transform_1, window_bounds = array<i64: 5>}, {pipeline_mode = #tpu.pipeline_mode<synchronous>, transform_indices = @transform_2, window_bounds = array<i64: 1, 64>}, {transform_indices = @transform_3, window_bounds = array<i64: 2>}, {transform_indices = @transform_4, window_bounds = array<i64: 2, 8, 1>}]} {
    %c0 = arith.constant 0 : index
    %c0_0 = arith.constant 0 : index
    %c0_1 = arith.constant 0 : index
    %c0_2 = arith.constant 0 : index
    %0 = vector.load %arg1[%c0, %c0_0, %c0_1, %c0_2] : memref<2x5x8x64xf32, #tpu.memory_space<vmem>>, vector<2x5x8x64xf32>
    %1 = vector.extract_strided_slice %0 {offsets = [0, 0, 0, 0], sizes = [2, 1, 8, 64], strides = [1, 1, 1, 1]} : vector<2x5x8x64xf32> to vector<2x1x8x64xf32>
    %2 = vector.shape_cast %1 : vector<2x1x8x64xf32> to vector<2x8x64xf32>
    %c0_3 = arith.constant 0 : index
    %3 = memref.load %arg2[%c0_3] : memref<5xf32, #tpu.memory_space<smem>>
    %4 = vector.broadcast %3 : f32 to vector<2x8x64xf32>
    %5 = arith.mulf %2, %4 : vector<2x8x64xf32>
    %6 = vector.extract_strided_slice %0 {offsets = [0, 1, 0, 0], sizes = [2, 1, 8, 64], strides = [1, 1, 1, 1]} : vector<2x5x8x64xf32> to vector<2x1x8x64xf32>
    %7 = vector.shape_cast %6 : vector<2x1x8x64xf32> to vector<2x8x64xf32>
    %c1 = arith.constant 1 : index
    %8 = memref.load %arg2[%c1] : memref<5xf32, #tpu.memory_space<smem>>
    %9 = vector.broadcast %8 : f32 to vector<2x8x64xf32>
    %10 = arith.mulf %7, %9 : vector<2x8x64xf32>
    %11 = arith.addf %5, %10 : vector<2x8x64xf32>
    %12 = vector.extract_strided_slice %0 {offsets = [0, 2, 0, 0], sizes = [2, 1, 8, 64], strides = [1, 1, 1, 1]} : vector<2x5x8x64xf32> to vector<2x1x8x64xf32>
    %13 = vector.shape_cast %12 : vector<2x1x8x64xf32> to vector<2x8x64xf32>
    %c2 = arith.constant 2 : index
    %14 = memref.load %arg2[%c2] : memref<5xf32, #tpu.memory_space<smem>>
    %15 = vector.broadcast %14 : f32 to vector<2x8x64xf32>
    %16 = arith.mulf %13, %15 : vector<2x8x64xf32>
    %17 = arith.addf %11, %16 : vector<2x8x64xf32>
    %18 = vector.extract_strided_slice %0 {offsets = [0, 3, 0, 0], sizes = [2, 1, 8, 64], strides = [1, 1, 1, 1]} : vector<2x5x8x64xf32> to vector<2x1x8x64xf32>
    %19 = vector.shape_cast %18 : vector<2x1x8x64xf32> to vector<2x8x64xf32>
    %c3 = arith.constant 3 : index
    %20 = memref.load %arg2[%c3] : memref<5xf32, #tpu.memory_space<smem>>
    %21 = vector.broadcast %20 : f32 to vector<2x8x64xf32>
    %22 = arith.mulf %19, %21 : vector<2x8x64xf32>
    %23 = arith.addf %17, %22 : vector<2x8x64xf32>
    %24 = vector.extract_strided_slice %0 {offsets = [0, 4, 0, 0], sizes = [2, 1, 8, 64], strides = [1, 1, 1, 1]} : vector<2x5x8x64xf32> to vector<2x1x8x64xf32>
    %25 = vector.shape_cast %24 : vector<2x1x8x64xf32> to vector<2x8x64xf32>
    %c4 = arith.constant 4 : index
    %26 = memref.load %arg2[%c4] : memref<5xf32, #tpu.memory_space<smem>>
    %27 = vector.broadcast %26 : f32 to vector<2x8x64xf32>
    %28 = arith.mulf %25, %27 : vector<2x8x64xf32>
    %29 = arith.addf %23, %28 : vector<2x8x64xf32>
    %c0_4 = arith.constant 0 : index
    %30 = memref.load %arg4[%c0_4] : memref<2xf32, #tpu.memory_space<smem>>
    %31 = vector.broadcast %30 : f32 to vector<2x8x64xf32>
    %32 = arith.addf %29, %31 : vector<2x8x64xf32>
    %cst = arith.constant 0.000000e+00 : f32
    %33 = vector.broadcast %cst : f32 to vector<2x8x64xf32>
    %34 = arith.maximumf %32, %33 : vector<2x8x64xf32>
    %c0_5 = arith.constant 0 : index
    %c0_6 = arith.constant 0 : index
    %35 = vector.load %arg3[%c0_5, %c0_6] : memref<1x64xf32, #tpu.memory_space<vmem>>, vector<1x64xf32>
    %36 = vector.shape_cast %35 : vector<1x64xf32> to vector<1x1x64xf32>
    %37 = vector.broadcast %36 : vector<1x1x64xf32> to vector<2x8x64xf32>
    %38 = arith.mulf %34, %37 : vector<2x8x64xf32>
    %cst_7 = arith.constant dense<0.000000e+00> : vector<2x8xf32>
    %39 = vector.multi_reduction <add>, %38, %cst_7 [2] : vector<2x8x64xf32> to vector<2x8xf32>
    %40 = vector.shape_cast %39 : vector<2x8xf32> to vector<2x8x1xf32>
    %c1_8 = arith.constant 1 : index
    %41 = memref.load %arg4[%c1_8] : memref<2xf32, #tpu.memory_space<smem>>
    %42 = vector.broadcast %41 : f32 to vector<2x8x1xf32>
    %43 = arith.addf %40, %42 : vector<2x8x1xf32>
    %c0_9 = arith.constant 0 : index
    %c0_10 = arith.constant 0 : index
    %c0_11 = arith.constant 0 : index
    %44 = vector.load %arg5[%c0_9, %c0_10, %c0_11] : memref<2x8x1xf32, #tpu.memory_space<vmem>>, vector<2x8x1xf32>
    tpu.vector_store %arg5[%c0_9, %c0_10, %c0_11], %43 {strides = array<i32>} : memref<2x8x1xf32, #tpu.memory_space<vmem>>, vector<2x8x1xf32>,
    return
  }
  func.func @transform_0(%arg0: i32) -> (i32, i32, i32, i32) {
    %c0_i32 = arith.constant 0 : i32
    %c0_i32_0 = arith.constant 0 : i32
    %c0_i32_1 = arith.constant 0 : i32
    %c0_i32_2 = arith.constant 0 : i32
    return %arg0, %c0_i32, %c0_i32_0, %c0_i32_1 : i32, i32, i32, i32
  }
  func.func @transform_1(%arg0: i32) -> i32 {
    %c0_i32 = arith.constant 0 : i32
    %c0_i32_0 = arith.constant 0 : i32
    return %c0_i32 : i32
  }
  func.func @transform_2(%arg0: i32) -> (i32, i32) {
    %c0_i32 = arith.constant 0 : i32
    %c0_i32_0 = arith.constant 0 : i32
    %c0_i32_1 = arith.constant 0 : i32
    return %c0_i32, %c0_i32_0 : i32, i32
  }
  func.func @transform_3(%arg0: i32) -> i32 {
    %c0_i32 = arith.constant 0 : i32
    %c0_i32_0 = arith.constant 0 : i32
    return %c0_i32 : i32
  }
  func.func @transform_4(%arg0: i32) -> (i32, i32, i32) {
    %c0_i32 = arith.constant 0 : i32
    %c0_i32_0 = arith.constant 0 : i32
    %c0_i32_1 = arith.constant 0 : i32
    return %arg0, %c0_i32, %c0_i32_0 : i32, i32, i32
  }
}

module attributes {stable_mosaic.version = 11 : i64} {
  func.func @_spat_att_kernel(%arg0: i32, %arg1: memref<10x8x32xbf16, #tpu.memory_space<vmem>>, %arg2: memref<32x64xbf16, #tpu.memory_space<vmem>>, %arg3: memref<32x4xbf16, #tpu.memory_space<vmem>>, %arg4: memref<32x64xbf16, #tpu.memory_space<vmem>>, %arg5: memref<1x64xf32, #tpu.memory_space<vmem>>, %arg6: memref<10x8x64xf32, #tpu.memory_space<vmem>>) attributes {dimension_semantics = [#tpu.dimension_semantics<parallel>], iteration_bounds = array<i64: 1>, scalar_prefetch = 0 : i64, scratch_operands = 0 : i64, tpu.core_type = #tpu.core_type<tc>, window_params = [{transform_indices = @transform_0, window_bounds = array<i64: 10, 8, 32>}, {pipeline_mode = #tpu.pipeline_mode<synchronous>, transform_indices = @transform_1, window_bounds = array<i64: 32, 64>}, {pipeline_mode = #tpu.pipeline_mode<synchronous>, transform_indices = @transform_2, window_bounds = array<i64: 32, 4>}, {pipeline_mode = #tpu.pipeline_mode<synchronous>, transform_indices = @transform_3, window_bounds = array<i64: 32, 64>}, {pipeline_mode = #tpu.pipeline_mode<synchronous>, transform_indices = @transform_4, window_bounds = array<i64: 1, 64>}, {transform_indices = @transform_5, window_bounds = array<i64: 10, 8, 64>}]} {
    %c0 = arith.constant 0 : index
    %c0_0 = arith.constant 0 : index
    %c0_1 = arith.constant 0 : index
    %0 = vector.load %arg1[%c0, %c0_0, %c0_1] : memref<10x8x32xbf16, #tpu.memory_space<vmem>>, vector<10x8x32xbf16>
    %1 = vector.shape_cast %0 : vector<10x8x32xbf16> to vector<80x32xbf16>
    %c0_2 = arith.constant 0 : index
    %c0_3 = arith.constant 0 : index
    %2 = vector.load %arg2[%c0_2, %c0_3] : memref<32x64xbf16, #tpu.memory_space<vmem>>, vector<32x64xbf16>
    %cst = arith.constant dense<0.000000e+00> : vector<80x64xf32>
    %3 = tpu.matmul %1, %2, %cst {dimension_numbers = #tpu.dot_dimension_numbers<[1], [0], [0], [1], [0, 0, 1, 1], [], []>} : vector<80x32xbf16>, vector<32x64xbf16>, vector<80x64xf32> -> vector<80x64xf32>
    %c0_4 = arith.constant 0 : index
    %c0_5 = arith.constant 0 : index
    %4 = vector.load %arg3[%c0_4, %c0_5] : memref<32x4xbf16, #tpu.memory_space<vmem>>, vector<32x4xbf16>
    %cst_6 = arith.constant dense<0.000000e+00> : vector<80x4xf32>
    %5 = tpu.matmul %1, %4, %cst_6 {dimension_numbers = #tpu.dot_dimension_numbers<[1], [0], [0], [1], [0, 0, 1, 1], [], []>} : vector<80x32xbf16>, vector<32x4xbf16>, vector<80x4xf32> -> vector<80x4xf32>
    %6 = vector.shape_cast %5 : vector<80x4xf32> to vector<10x8x4xf32>
    %cst_7 = arith.constant 0.000000e+00 : f32
    %7 = vector.broadcast %cst_7 : f32 to vector<10x8x32xf32>
    %8 = vector.extract_strided_slice %6 {offsets = [0, 0, 0], sizes = [10, 8, 1], strides = [1, 1, 1]} : vector<10x8x4xf32> to vector<10x8x1xf32>
    %9 = vector.shape_cast %8 : vector<10x8x1xf32> to vector<10x8xf32>
    %10 = vector.shape_cast %9 : vector<10x8xf32> to vector<10x8x1xf32>
    %11 = vector.extract_strided_slice %6 {offsets = [0, 0, 2], sizes = [10, 8, 1], strides = [1, 1, 1]} : vector<10x8x4xf32> to vector<10x8x1xf32>
    %12 = vector.shape_cast %11 : vector<10x8x1xf32> to vector<10x8xf32>
    %13 = vector.shape_cast %12 : vector<10x8xf32> to vector<10x1x8xf32>
    %14 = vector.broadcast %10 : vector<10x8x1xf32> to vector<10x8x8xf32>
    %15 = vector.broadcast %13 : vector<10x1x8xf32> to vector<10x8x8xf32>
    %16 = arith.addf %14, %15 : vector<10x8x8xf32>
    %cst_8 = arith.constant 0.000000e+00 : f32
    %17 = vector.broadcast %cst_8 : f32 to vector<10x8x8xf32>
    %18 = arith.cmpf ogt, %16, %17 : vector<10x8x8xf32>
    %cst_9 = arith.constant 2.000000e-01 : f32
    %19 = vector.broadcast %cst_9 : f32 to vector<10x8x8xf32>
    %20 = arith.mulf %19, %16 : vector<10x8x8xf32>
    %21 = arith.select %18, %16, %20 : vector<10x8x8xi1>, vector<10x8x8xf32>
    %cst_10 = arith.constant dense<0xFF800000> : vector<10x8xf32>
    %22 = vector.multi_reduction <maximumf>, %21, %cst_10 [2] : vector<10x8x8xf32> to vector<10x8xf32>
    %23 = vector.shape_cast %22 : vector<10x8xf32> to vector<10x8x1xf32>
    %24 = vector.broadcast %23 : vector<10x8x1xf32> to vector<10x8x8xf32>
    %25 = arith.subf %21, %24 : vector<10x8x8xf32>
    %26 = math.exp %25 : vector<10x8x8xf32>
    %cst_11 = arith.constant dense<0.000000e+00> : vector<10x8xf32>
    %27 = vector.multi_reduction <add>, %26, %cst_11 [2] : vector<10x8x8xf32> to vector<10x8xf32>
    %28 = vector.shape_cast %27 : vector<10x8xf32> to vector<10x8x1xf32>
    %29 = tpu.reciprocal %28 {approx = true} : vector<10x8x1xf32> -> vector<10x8x1xf32>
    %30 = vector.broadcast %29 : vector<10x8x1xf32> to vector<10x8x8xf32>
    %31 = arith.mulf %26, %30 : vector<10x8x8xf32>
    %32 = vector.extract_strided_slice %3 {offsets = [0, 0], sizes = [80, 32], strides = [1, 1]} : vector<80x64xf32> to vector<80x32xf32>
    %33 = vector.shape_cast %32 : vector<80x32xf32> to vector<10x8x32xf32>
    %34 = arith.truncf %31 : vector<10x8x8xf32> to vector<10x8x8xbf16>
    %35 = arith.truncf %33 : vector<10x8x32xf32> to vector<10x8x32xbf16>
    "tpu.trace_start"() <{level = 10 : i32, message = "gij,gjh->gih"}> : () -> ()
    %cst_12 = arith.constant dense<0.000000e+00> : vector<10x8x32xf32>
    %36 = tpu.matmul %34, %35, %cst_12 {dimension_numbers = #tpu.dot_dimension_numbers<[2], [1], [1], [2], [0, 0, 0, 1, 1, 2], [0], [0]>} : vector<10x8x8xbf16>, vector<10x8x32xbf16>, vector<10x8x32xf32> -> vector<10x8x32xf32>
    "tpu.trace_stop"() : () -> ()
    %37 = arith.addf %7, %36 : vector<10x8x32xf32>
    %38 = vector.extract_strided_slice %6 {offsets = [0, 0, 1], sizes = [10, 8, 1], strides = [1, 1, 1]} : vector<10x8x4xf32> to vector<10x8x1xf32>
    %39 = vector.shape_cast %38 : vector<10x8x1xf32> to vector<10x8xf32>
    %40 = vector.shape_cast %39 : vector<10x8xf32> to vector<10x8x1xf32>
    %41 = vector.extract_strided_slice %6 {offsets = [0, 0, 3], sizes = [10, 8, 1], strides = [1, 1, 1]} : vector<10x8x4xf32> to vector<10x8x1xf32>
    %42 = vector.shape_cast %41 : vector<10x8x1xf32> to vector<10x8xf32>
    %43 = vector.shape_cast %42 : vector<10x8xf32> to vector<10x1x8xf32>
    %44 = vector.broadcast %40 : vector<10x8x1xf32> to vector<10x8x8xf32>
    %45 = vector.broadcast %43 : vector<10x1x8xf32> to vector<10x8x8xf32>
    %46 = arith.addf %44, %45 : vector<10x8x8xf32>
    %cst_13 = arith.constant 0.000000e+00 : f32
    %47 = vector.broadcast %cst_13 : f32 to vector<10x8x8xf32>
    %48 = arith.cmpf ogt, %46, %47 : vector<10x8x8xf32>
    %cst_14 = arith.constant 2.000000e-01 : f32
    %49 = vector.broadcast %cst_14 : f32 to vector<10x8x8xf32>
    %50 = arith.mulf %49, %46 : vector<10x8x8xf32>
    %51 = arith.select %48, %46, %50 : vector<10x8x8xi1>, vector<10x8x8xf32>
    %cst_15 = arith.constant dense<0xFF800000> : vector<10x8xf32>
    %52 = vector.multi_reduction <maximumf>, %51, %cst_15 [2] : vector<10x8x8xf32> to vector<10x8xf32>
    %53 = vector.shape_cast %52 : vector<10x8xf32> to vector<10x8x1xf32>
    %54 = vector.broadcast %53 : vector<10x8x1xf32> to vector<10x8x8xf32>
    %55 = arith.subf %51, %54 : vector<10x8x8xf32>
    %56 = math.exp %55 : vector<10x8x8xf32>
    %cst_16 = arith.constant dense<0.000000e+00> : vector<10x8xf32>
    %57 = vector.multi_reduction <add>, %56, %cst_16 [2] : vector<10x8x8xf32> to vector<10x8xf32>
    %58 = vector.shape_cast %57 : vector<10x8xf32> to vector<10x8x1xf32>
    %59 = tpu.reciprocal %58 {approx = true} : vector<10x8x1xf32> -> vector<10x8x1xf32>
    %60 = vector.broadcast %59 : vector<10x8x1xf32> to vector<10x8x8xf32>
    %61 = arith.mulf %56, %60 : vector<10x8x8xf32>
    %62 = vector.extract_strided_slice %3 {offsets = [0, 32], sizes = [80, 32], strides = [1, 1]} : vector<80x64xf32> to vector<80x32xf32>
    %63 = vector.shape_cast %62 : vector<80x32xf32> to vector<10x8x32xf32>
    %64 = arith.truncf %61 : vector<10x8x8xf32> to vector<10x8x8xbf16>
    %65 = arith.truncf %63 : vector<10x8x32xf32> to vector<10x8x32xbf16>
    "tpu.trace_start"() <{level = 10 : i32, message = "gij,gjh->gih"}> : () -> ()
    %cst_17 = arith.constant dense<0.000000e+00> : vector<10x8x32xf32>
    %66 = tpu.matmul %64, %65, %cst_17 {dimension_numbers = #tpu.dot_dimension_numbers<[2], [1], [1], [2], [0, 0, 0, 1, 1, 2], [0], [0]>} : vector<10x8x8xbf16>, vector<10x8x32xbf16>, vector<10x8x32xf32> -> vector<10x8x32xf32>
    "tpu.trace_stop"() : () -> ()
    %67 = arith.addf %37, %66 : vector<10x8x32xf32>
    %cst_18 = arith.constant 5.000000e-01 : f32
    %68 = vector.broadcast %cst_18 : f32 to vector<10x8x32xf32>
    %69 = arith.mulf %67, %68 : vector<10x8x32xf32>
    %c0_19 = arith.constant 0 : index
    %c0_20 = arith.constant 0 : index
    %70 = vector.load %arg4[%c0_19, %c0_20] : memref<32x64xbf16, #tpu.memory_space<vmem>>, vector<32x64xbf16>
    %cst_21 = arith.constant dense<0.000000e+00> : vector<80x64xf32>
    %71 = tpu.matmul %1, %70, %cst_21 {dimension_numbers = #tpu.dot_dimension_numbers<[1], [0], [0], [1], [0, 0, 1, 1], [], []>} : vector<80x32xbf16>, vector<32x64xbf16>, vector<80x64xf32> -> vector<80x64xf32>
    %c0_22 = arith.constant 0 : index
    %c0_23 = arith.constant 0 : index
    %72 = vector.load %arg5[%c0_22, %c0_23] : memref<1x64xf32, #tpu.memory_space<vmem>>, vector<1x64xf32>
    %73 = vector.broadcast %72 : vector<1x64xf32> to vector<80x64xf32>
    %74 = arith.addf %71, %73 : vector<80x64xf32>
    %75 = vector.extract_strided_slice %74 {offsets = [0, 0], sizes = [80, 32], strides = [1, 1]} : vector<80x64xf32> to vector<80x32xf32>
    %76 = arith.negf %75 : vector<80x32xf32>
    %77 = math.exp %76 : vector<80x32xf32>
    %cst_24 = arith.constant 1.000000e+00 : f32
    %78 = vector.broadcast %cst_24 : f32 to vector<80x32xf32>
    %79 = arith.addf %78, %77 : vector<80x32xf32>
    %80 = arith.divf %78, %79 : vector<80x32xf32>
    %81 = vector.extract_strided_slice %74 {offsets = [0, 32], sizes = [80, 32], strides = [1, 1]} : vector<80x64xf32> to vector<80x32xf32>
    %82 = arith.mulf %80, %81 : vector<80x32xf32>
    %83 = vector.shape_cast %82 : vector<80x32xf32> to vector<10x8x32xf32>
    %84 = tpu.concatenate %83, %69 in 2 : vector<10x8x32xf32>, vector<10x8x32xf32> -> vector<10x8x64xf32>
    %c0_25 = arith.constant 0 : index
    %c0_26 = arith.constant 0 : index
    %c0_27 = arith.constant 0 : index
    %85 = vector.load %arg6[%c0_25, %c0_26, %c0_27] : memref<10x8x64xf32, #tpu.memory_space<vmem>>, vector<10x8x64xf32>
    tpu.vector_store %arg6[%c0_25, %c0_26, %c0_27], %84 {strides = array<i32>} : memref<10x8x64xf32, #tpu.memory_space<vmem>>, vector<10x8x64xf32>,
    return
  }
  func.func @transform_0(%arg0: i32) -> (i32, i32, i32) {
    %c0_i32 = arith.constant 0 : i32
    %c0_i32_0 = arith.constant 0 : i32
    %c0_i32_1 = arith.constant 0 : i32
    return %arg0, %c0_i32, %c0_i32_0 : i32, i32, i32
  }
  func.func @transform_1(%arg0: i32) -> (i32, i32) {
    %c0_i32 = arith.constant 0 : i32
    %c0_i32_0 = arith.constant 0 : i32
    %c0_i32_1 = arith.constant 0 : i32
    return %c0_i32, %c0_i32_0 : i32, i32
  }
  func.func @transform_2(%arg0: i32) -> (i32, i32) {
    %c0_i32 = arith.constant 0 : i32
    %c0_i32_0 = arith.constant 0 : i32
    %c0_i32_1 = arith.constant 0 : i32
    return %c0_i32, %c0_i32_0 : i32, i32
  }
  func.func @transform_3(%arg0: i32) -> (i32, i32) {
    %c0_i32 = arith.constant 0 : i32
    %c0_i32_0 = arith.constant 0 : i32
    %c0_i32_1 = arith.constant 0 : i32
    return %c0_i32, %c0_i32_0 : i32, i32
  }
  func.func @transform_4(%arg0: i32) -> (i32, i32) {
    %c0_i32 = arith.constant 0 : i32
    %c0_i32_0 = arith.constant 0 : i32
    %c0_i32_1 = arith.constant 0 : i32
    return %c0_i32, %c0_i32_0 : i32, i32
  }
  func.func @transform_5(%arg0: i32) -> (i32, i32, i32) {
    %c0_i32 = arith.constant 0 : i32
    %c0_i32_0 = arith.constant 0 : i32
    %c0_i32_1 = arith.constant 0 : i32
    return %arg0, %c0_i32, %c0_i32_0 : i32, i32, i32
  }
}

</mosaic_0001>

<bundles_post_ra>
// kernel: bapm2_forward.5
= control target key start
LH: loop header
LB: loop body
LE: loop exit
PB: predicated region body
PF: predicated region fallthrough
CT: control target
= control target key end

     0   :  { %9 = vsyncpa [#allocation3], 0  ;;  %s223_s0 = inlined_call_operand.vmem [shape: f32[2,5,8,64], index: 0, kind: input, shape index: {}]   ;;  %s224_s1 = inlined_call_operand.vmem [shape: f32[5], index: 1, kind: input, shape index: {}]   ;;  %s225_s2 = inlined_call_operand.vmem [shape: f32[1,64], index: 2, kind: input, shape index: {}]   ;;  %s226_s3 = inlined_call_operand.vmem [shape: f32[2], index: 3, kind: input, shape index: {}]   ;;  %s227_s4 = inlined_call_operand.vmem [shape: f32[2,8,1], index: 4, kind: output, shape index: {}]  }
   0x1   :  { %s19_s17 = sshll.u32 %s224_s1, 4  ;;  %s20_s17 = int_to_ptr.vmem [resolvable:$true] %s19_s17 }
   0x2   :  { %10 = vsyncpa [#allocation5], 0  ;;  %s31_s20 = sshll.u32 %s226_s3, 4  ;;  %s123_s21 = scalar_lea.vmem %s20_s17, 16  ;;  %s32_s20 = int_to_ptr.vmem [resolvable:$true] %s31_s20 }
   0x3   :  { %p124_p0 = scmp.ne.s32.totalorder %s20_s17, %s123_s21  ;;  %p128_p1 = scmp.lt.s32.totalorder %s20_s17, %s20_s17 }
   0x4   :  { %p129_p2 = scmp.lt.s32.totalorder %s123_s21, %s123_s21 }
   0x6   :  { %p130_p3 = por %p129_p2, %p128_p1 }
   0x8   :  { %p131_p4 = pnand %p130_p3, %p124_p0 }
   0xa   :  { %134 = shalt.err (!%p131_p4)
}
   0xb   :  { %s151_s22 = smov [#allocation2]   ;;  %s135_s23 = scalar_lea.vmem %s32_s20, 16 }
   0xc   :  { %22 = dma.vmem_to_smem %s20_s17, 16, %s151_s22, [#allocation3]  }
   0xd   :  { %p136_p5 = scmp.ne.s32.totalorder %s32_s20, %s135_s23  ;;  %p140_p6 = scmp.lt.s32.totalorder %s32_s20, %s32_s20 }
   0xe   :  { %p141_p7 = scmp.lt.s32.totalorder %s135_s23, %s135_s23 }
  0x10   :  { %p142_p8 = por %p141_p7, %p140_p6 }
  0x12   :  { %p143_p9 = pnand %p142_p8, %p136_p5 }
  0x14   :  { %146 = shalt.err (!%p143_p9)
}
  0x15   :  { %s152_s1 = smov [#allocation4]  }
  0x16   :  { %34 = dma.vmem_to_smem %s32_s20, 16, %s152_s1, [#allocation5]  }
  0x17   :  { %147 = dma.done.wait [#allocation3], 16  }
  0x18   :  { %148 = vsyncadd [#allocation3], 4294967280 }
  0x19   :  { %149 = dma.done.wait [#allocation5], 16  }
  0x1a   :  { %150 = vsyncadd [#allocation5], 4294967280 }
  0x1b   :  { %41 = sfence }
  0x1c   :  { %s52_s3 = sld [smem:[#allocation2]]  ;;  %s115_s24 = sld [smem:[#allocation2 + $0x1]]  ;;  %v42_v0 = vld [vmem:[%s223_s0] sm:$0xff]  ;;  %v47_v1 = vld [vmem:[%s223_s0 + $0x28] sm:$0xff]  ;;  %v44_v3 = vld [vmem:[%s223_s0 + $0x10] sm:$0xff]  ;;  %vm95_vm0 = vcmask 523264  }
  0x1d   :  { %s116_s25 = sld [smem:[#allocation2 + $0x2]]  ;;  %s117_s26 = sld [smem:[#allocation2 + $0x3]]  ;;  %v43_v2 = vld [vmem:[%s223_s0 + $0x8] sm:$0xff]  ;;  %v48_v5 = vld [vmem:[%s223_s0 + $0x30] sm:$0xff]  ;;  %v45_v6 = vld [vmem:[%s223_s0 + $0x18] sm:$0xff]  ;;  %vm106_vm1 = vcmask 7168  }
  0x1e   :  { %s118_s27 = sld [smem:[#allocation2 + $0x4]]  ;;  %s80_s14 = sld [smem:[#allocation4]]  ;;  %v49_v10 = vld [vmem:[%s223_s0 + $0x38] sm:$0xff]  ;;  %v50_v15 = vld [vmem:[%s223_s0 + $0x40] sm:$0xff]  ;;  %v51_v21 = vld [vmem:[%s223_s0 + $0x48] sm:$0xff] }
  0x1f   :  { %v46_v16 = vld [vmem:[%s223_s0 + $0x20] sm:$0xff]  ;;  %s120_s0 = sld [smem:[#allocation4 + $0x1]] }
  0x20   :  { %v119_v35 = vld [vmem:[%s225_s2] ss:$0 sm:$0xff] }
  0x22   :  { %v53_v4 = vstv %s52_s3  ;;  %v57_v8 = vstv %s115_s24 }
  0x23   :  { %v54_v7 = vmul.f32 %v53_v4, %v42_v0  ;;  %v63_v9 = vstv %s116_s25  ;;  %v55_v11 = vmul.f32 %v53_v4, %v47_v1  ;;  %v58_v12 = vmul.f32 %v57_v8, %v43_v2 }
  0x24   :  { %v64_v13 = vmul.f32 %v63_v9, %v44_v3  ;;  %v69_v14 = vstv %s117_s26  ;;  %v75_v17 = vstv %s118_s27  ;;  %v59_v18 = vmul.f32 %v57_v8, %v48_v5 }
  0x25   :  { %v60_v19 = vadd.f32 %v58_v12, %v54_v7  ;;  %v70_v20 = vmul.f32 %v69_v14, %v45_v6  ;;  %v65_v22 = vmul.f32 %v63_v9, %v49_v10  ;;  %v71_v24 = vmul.f32 %v69_v14, %v50_v15 }
  0x26   :  { %v61_v23 = vadd.f32 %v59_v18, %v55_v11  ;;  %v76_v26 = vmul.f32 %v75_v17, %v46_v16  ;;  %v77_v28 = vmul.f32 %v75_v17, %v51_v21  ;;  %v81_v30 = vstv %s80_s14 }
  0x27   :  { %v66_v25 = vadd.f32 %v64_v13, %v60_v19  ;;  %v103_v43 = vstv %s120_s0 }
  0x28   :  { %v67_v27 = vadd.f32 %v65_v22, %v61_v23 }
  0x29   :  { %v72_v29 = vadd.f32 %v70_v20, %v66_v25 }
  0x2a   :  { %v73_v31 = vadd.f32 %v71_v24, %v67_v27 }
  0x2b   :  { %v78_v32 = vadd.f32 %v76_v26, %v72_v29 }
  0x2c   :  { %v79_v33 = vadd.f32 %v77_v28, %v73_v31 }
  0x2d   :  { %v82_v34 = vadd.f32 %v81_v30, %v78_v32 }
  0x2e   :  { %v83_v36 = vadd.f32 %v81_v30, %v79_v33 }
  0x2f   :  { %v84_v37 = vmax.f32 %v82_v34, 0.0 }
  0x30   :  { %v85_v38 = vmax.f32 %v83_v36, 0.0 }
  0x31   :  { %v93_v39 = vmul.f32 %v119_v35, %v84_v37 }
  0x32   :  { %v94_v40 = vmul.f32 %v119_v35, %v85_v38 }
  0x33   :  { %v96_v41 = vsel %vm95_vm0, %v93_v39, 0.0 }
  0x34   :  { %97 = vadd.xlane.f32.xlu0 %v96_v41  ;;  %v99_v42 = vsel %vm95_vm0, %v94_v40, 0.0 }
  0x38   :  { %100 = vadd.xlane.f32.xlu0 %v99_v42 }
  0xc1   :  { %v98_v44 = vpop.xlane.xlu0 %97 }
  0xc2   :  { %v104_v45 = vadd.f32 %v103_v43, %v98_v44 }
  0xc4   :  { %107 = vst.msk [vmem:[%s227_s4] sm:$0xff] %vm106_vm1, %v104_v45 }
  0xc5   :  { %v101_v46 = vpop.xlane.xlu0 %100 }
  0xc6   :  { %v105_v47 = vadd.f32 %v103_v43, %v101_v46 }
  0xc8   :  { %108 = vst.msk [vmem:[%s227_s4 + $0x8] sm:$0xff] %vm106_vm1, %v105_v47 }
  0xc9   :  { %113 = vsyncpa [#allocation3], 1 }
  0xca   :  { %114 = vsyncpa [#allocation5], 1 }

// kernel: bapm2_forward.3
= control target key start
LH: loop header
LB: loop body
LE: loop exit
PB: predicated region body
PF: predicated region fallthrough
CT: control target
= control target key end

     0   :  { %v304_v0 = vmov 0.0   ;;  %vm305_vm0 = vmmov 0   ;;  %vm73_vm1 = vcmask 261120   ;;  %vm212_vm2 = vcmask 257024   ;;  %s395_s1 = inlined_call_operand.vmem [shape: bf16[32,32], index: 1, kind: input, shape index: {}]   ;;  %s396_s0 = inlined_call_operand.vmem [shape: bf16[80,32], index: 0, kind: input, shape index: {}]   ;;  %s397_s2 = inlined_call_operand.vmem [shape: f32[1,32], index: 2, kind: input, shape index: {}]   ;;  %s398_s3 = inlined_call_operand.vmem [shape: bf16[80,32], index: 3, kind: output, shape index: {}]  }
   0x1   :  { %267 = vmatprep.subr.bf16.mxu0 %v304_v0  ;;  %v297_v1 = vld [vmem:[%s395_s1] sm:$0xff]   ;;  %291 = vmatprep.subr.bf16.mxu1 %v304_v0  ;;  %v298_v2 = vld [vmem:[%s395_s1 + $0x8] sm:$0xff]   ;;  %v300_v4 = vld [vmem:[%s396_s0 + $0x18] sm:$0xff]  }
   0x2   :  { %271 = vmatprep.mubr.msk.bf16.mxu0 %vm305_vm0, %v304_v0  ;;  %283 = vmatprep.mubr.msk.bf16.mxu1 %vm305_vm0, %v304_v0  ;;  %v299_v3 = vld [vmem:[%s396_s0] sm:$0xff]   ;;  %v301_v5 = vld [vmem:[%s396_s0 + $0x8] sm:$0xff]   ;;  %v303_v7 = vld [vmem:[%s396_s0 + $0x10] sm:$0xff]  }
   0x3   :  { %268 = vmatpush3.bf16.msra.mxu0 %v297_v1  ;;  %293 = vmatpush3.bf16.msra.mxu1 %v297_v1  ;;  %v302_v6 = vld [vmem:[%s396_s0 + $0x20] sm:$0xff]  }
   0x4   :  { %269 = vmatprep.subr.bf16.mxu0 %v304_v0  ;;  %292 = vmatprep.subr.bf16.mxu1 %v304_v0  ;;  %v227_v8 = vld [vmem:[%s397_s2] ss:$0 sm:$0xff] }
   0x7   :  { %270 = vmatpush3.bf16.msra.mxu0 %v298_v2  ;;  %294 = vmatpush3.bf16.msra.mxu1 %v298_v2 }
   0xa   :  { %272 = vmatmul.mubr.msk.bf16.vlgmr.msra.gmra.mrb[0].mxu0 %vm73_vm1, %v299_v3  ;;  %284 = vmatmul.mubr.msk.bf16.vlgmr.msra.gmra.mrb[0].mxu1 %vm73_vm1, %v300_v4 }
   0xb   :  { %275 = vmatprep.mubr.msk.bf16.mxu0 %vm305_vm0, %v304_v0  ;;  %287 = vmatprep.mubr.msk.bf16.mxu1 %vm305_vm0, %v304_v0 }
  0x12   :  { %276 = vmatmul.mubr.msk.bf16.gmra.mrb[4].mxu0 %vm73_vm1, %v301_v5  ;;  %288 = vmatmul.mubr.msk.bf16.gmra.mrb[4].mxu1 %vm73_vm1, %v302_v6 }
  0x13   :  { %279 = vmatprep.mubr.msk.bf16.mxu0 %vm305_vm0, %v304_v0 }
  0x1a   :  { %280 = vmatmul.mubr.msk.bf16.gmra.mrb[8].mxu0 %vm73_vm1, %v303_v7 }
  0xdd   :  { %v123_v9 = vpop.f32.mrb[0].mxu0  ;;  %v147_v10 = vpop.f32.mrb[0].mxu1 }
  0xde   :  { %v124_v11 = vadd.f32 %v227_v8, %v123_v9  ;;  %v273_v12 = vpop.f32.mrb[1].mxu0  ;;  %v148_v13 = vadd.f32 %v227_v8, %v147_v10  ;;  %v285_v14 = vpop.f32.mrb[1].mxu1 }
  0xdf   :  { %v126_v15 = vpop.f32.mrb[2].mxu0  ;;  %v150_v16 = vpop.f32.mrb[2].mxu1 }
  0xe0   :  { %v162_v17 = vmax.f32 %v124_v11, 0.0  ;;  %v127_v18 = vadd.f32 %v227_v8, %v126_v15  ;;  %v274_v19 = vpop.f32.mrb[3].mxu0  ;;  %v168_v20 = vmax.f32 %v148_v13, 0.0  ;;  %v151_v21 = vadd.f32 %v227_v8, %v150_v16  ;;  %v286_v22 = vpop.f32.mrb[3].mxu1 }
  0xe2   :  { %v250_v23 = vpack.c.bf16 %v162_v17, %v162_v17  ;;  %v163_v24 = vmax.f32 %v127_v18, 0.0  ;;  %v256_v25 = vpack.c.bf16 %v168_v20, %v168_v20  ;;  %v169_v26 = vmax.f32 %v151_v21, 0.0 }
  0xe4   :  { %213 = vst.msk [vmem:[%s398_s3] sm:$0xf] %vm212_vm2, %v250_v23  ;;  %v251_v27 = vpack.c.bf16 %v163_v24, %v163_v24  ;;  %219 = vst.msk [vmem:[%s398_s3 + $0x18] sm:$0xf] %vm212_vm2, %v256_v25  ;;  %v257_v28 = vpack.c.bf16 %v169_v26, %v169_v26 }
  0xe5   :  { %v131_v29 = vpop.f32.mrb[4].mxu0  ;;  %v155_v30 = vpop.f32.mrb[4].mxu1 }
  0xe6   :  { %214 = vst.msk [vmem:[%s398_s3 + $0x4] sm:$0xf] %vm212_vm2, %v251_v27  ;;  %220 = vst.msk [vmem:[%s398_s3 + $0x1c] sm:$0xf] %vm212_vm2, %v257_v28  ;;  %v132_v31 = vadd.f32 %v227_v8, %v131_v29  ;;  %v277_v32 = vpop.f32.mrb[5].mxu0  ;;  %v156_v33 = vadd.f32 %v227_v8, %v155_v30  ;;  %v289_v34 = vpop.f32.mrb[5].mxu1 }
  0xe7   :  { %v134_v35 = vpop.f32.mrb[6].mxu0  ;;  %v158_v36 = vpop.f32.mrb[6].mxu1 }
  0xe8   :  { %v164_v37 = vmax.f32 %v132_v31, 0.0  ;;  %v135_v38 = vadd.f32 %v227_v8, %v134_v35  ;;  %v278_v39 = vpop.f32.mrb[7].mxu0  ;;  %v170_v40 = vmax.f32 %v156_v33, 0.0  ;;  %v159_v41 = vadd.f32 %v227_v8, %v158_v36  ;;  %v290_v42 = vpop.f32.mrb[7].mxu1 }
  0xea   :  { %v252_v43 = vpack.c.bf16 %v164_v37, %v164_v37  ;;  %v165_v44 = vmax.f32 %v135_v38, 0.0  ;;  %v258_v45 = vpack.c.bf16 %v170_v40, %v170_v40  ;;  %v171_v46 = vmax.f32 %v159_v41, 0.0 }
  0xec   :  { %215 = vst.msk [vmem:[%s398_s3 + $0x8] sm:$0xf] %vm212_vm2, %v252_v43  ;;  %v253_v47 = vpack.c.bf16 %v165_v44, %v165_v44  ;;  %221 = vst.msk [vmem:[%s398_s3 + $0x20] sm:$0xf] %vm212_vm2, %v258_v45  ;;  %v259_v48 = vpack.c.bf16 %v171_v46, %v171_v46 }
  0xed   :  { %v139_v49 = vpop.f32.mrb[8].mxu0 }
  0xee   :  { %216 = vst.msk [vmem:[%s398_s3 + $0xc] sm:$0xf] %vm212_vm2, %v253_v47  ;;  %222 = vst.msk [vmem:[%s398_s3 + $0x24] sm:$0xf] %vm212_vm2, %v259_v48  ;;  %v140_v50 = vadd.f32 %v227_v8, %v139_v49  ;;  %v281_v51 = vpop.f32.mrb[9].mxu0 }
  0xef   :  { %v142_v52 = vpop.f32.mrb[10].mxu0 }
  0xf0   :  { %v166_v53 = vmax.f32 %v140_v50, 0.0  ;;  %v143_v54 = vadd.f32 %v227_v8, %v142_v52  ;;  %v282_v55 = vpop.f32.mrb[11].mxu0 }
  0xf2   :  { %v254_v56 = vpack.c.bf16 %v166_v53, %v166_v53  ;;  %v167_v57 = vmax.f32 %v143_v54, 0.0 }
  0xf4   :  { %217 = vst.msk [vmem:[%s398_s3 + $0x10] sm:$0xf] %vm212_vm2, %v254_v56  ;;  %v255_v58 = vpack.c.bf16 %v167_v57, %v167_v57 }
  0xf6   :  { %218 = vst.msk [vmem:[%s398_s3 + $0x14] sm:$0xf] %vm212_vm2, %v255_v58 }

// kernel: bapm2_forward.4
= control target key start
LH: loop header
LB: loop body
LE: loop exit
PB: predicated region body
PF: predicated region fallthrough
CT: control target
= control target key end

     0   :  { %v2730_v0 = vmov 0.0   ;;  %vm2731_vm0 = vmmov 0   ;;  %vm72_vm1 = vcmask 261120   ;;  %v2732_v10 = vmov 3   ;;  %s2734_s9 = smov 96   ;;  %s3441_s1 = inlined_call_operand.vmem [shape: bf16[32,64], index: 1, kind: input, shape index: {}]   ;;  %s3442_s0 = inlined_call_operand.vmem [shape: bf16[10,8,32], index: 0, kind: input, shape index: {}]   ;;  %s3443_s2 = inlined_call_operand.vmem [shape: bf16[32,4], index: 2, kind: input, shape index: {}]   ;;  %s3444_s3 = inlined_call_operand.vmem [shape: bf16[32,64], index: 3, kind: input, shape index: {}]   ;;  %s3445_s4 = inlined_call_operand.vmem [shape: f32[1,64], index: 4, kind: input, shape index: {}]   ;;  %s3446_s5 = inlined_call_operand.vmem [shape: f32[10,8,64], index: 5, kind: output, shape index: {}]  }
   0x1   :  { %2309 = vmatprep.subr.bf16.mxu0 %v2730_v0  ;;  %2501 = vmatprep.subr.bf16.mxu1 %v2730_v0  ;;  %v2594_v1 = vld [vmem:[%s3441_s1] sm:$0xff]   ;;  %v2595_v2 = vld [vmem:[%s3441_s1 + $0x8] sm:$0xff]   ;;  %v2597_v4 = vld [vmem:[%s3442_s0 + $0x18] sm:$0xff]   ;;  %v2733_v11 = vmov 2   ;;  %v2735_v39 = vmov 1   ;;  %v2736_v42 = vmov 0   ;;  %v330_v60 = vlaneseq }
   0x2   :  { %2313 = vmatprep.mubr.msk.bf16.mxu0 %vm2731_vm0, %v2730_v0  ;;  %2325 = vmatprep.mubr.msk.bf16.mxu1 %vm2731_vm0, %v2730_v0  ;;  %v2596_v3 = vld [vmem:[%s3442_s0] sm:$0xff]   ;;  %v2600_v6 = vld [vmem:[%s3443_s2 + $0x8] sm:$0xff]   ;;  %v2602_v9 = vld [vmem:[%s3442_s0 + $0x10] sm:$0xff]   ;;  %vm965_vm2 = vcmask 1043456   ;;  %vm488_vm5 = vcmask 64512  }
   0x3   :  { %2310 = vmatpush3.bf16.msra.mxu0 %v2594_v1  ;;  %2503 = vmatpush3.bf16.msra.mxu1 %v2594_v1  ;;  %v2598_v5 = vld [vmem:[%s3443_s2] sm:$0xff]   ;;  %v2601_v8 = vld [vmem:[%s3442_s0 + $0x8] sm:$0xff]   ;;  %v331_v63 = vand.u32 127, %v330_v60  ;;  %v333_v1 = vshrl.u32 %v330_v60, 7 }
   0x4   :  { %2311 = vmatprep.subr.bf16.mxu0 %v2730_v0  ;;  %2502 = vmatprep.subr.bf16.mxu1 %v2730_v0  ;;  %v2599_v7 = vld [vmem:[%s3442_s0 + $0x20] sm:$0xff]  }
   0x5   :  { %2553 = vset.pattern.permute.xlu0 %v2732_v10  ;;  %2555 = vset.pattern.permute.xlu1 %v2733_v11 }
   0x7   :  { %2312 = vmatpush3.bf16.msra.mxu0 %v2595_v2  ;;  %2504 = vmatpush3.bf16.msra.mxu1 %v2595_v2 }
   0x8   :  { %2333 = vmatprep.subr.bf16.mxu1 %v2730_v0  ;;  %2357 = vmatprep.subr.bf16.mxu0 %v2730_v0 }
   0xa   :  { %2314 = vmatmul.mubr.msk.bf16.vlgmr.msra.gmra.mrb[0].mxu0 %vm72_vm1, %v2596_v3  ;;  %2326 = vmatmul.mubr.msk.bf16.vlgmr.msra.gmra.mrb[0].mxu1 %vm72_vm1, %v2597_v4 }
   0xb   :  { %2334 = vmatpush3.bf16.msra.mxu1 %v2598_v5  ;;  %2329 = vmatprep.mubr.msk.bf16.mxu1 %vm2731_vm0, %v2730_v0 }
   0xc   :  { %2335 = vmatprep.subr.bf16.mxu1 %v2730_v0  ;;  %2317 = vmatprep.mubr.msk.bf16.mxu0 %vm2731_vm0, %v2730_v0 }
   0xf   :  { %2336 = vmatpush3.bf16.msra.mxu1 %v2600_v6 }
  0x10   :  { %2363 = vmatprep.subr.bf16.mxu1 %v2730_v0 }
  0x12   :  { %2330 = vmatmul.mubr.msk.bf16.gmra.mrb[4].mxu1 %vm72_vm1, %v2599_v7  ;;  %2318 = vmatmul.mubr.msk.bf16.gmra.mrb[4].mxu0 %vm72_vm1, %v2601_v8 }
  0x13   :  { %2337 = vmatprep.mubr.msk.bf16.mxu1 %vm2731_vm0, %v2730_v0  ;;  %2321 = vmatprep.mubr.msk.bf16.mxu0 %vm2731_vm0, %v2730_v0 }
  0x1a   :  { %2338 = vmatmul.mubr.msk.bf16.vlgmr.msra.gmra.mrb[8].mxu1 %vm72_vm1, %v2596_v3  ;;  %2322 = vmatmul.mubr.msk.bf16.gmra.mrb[8].mxu0 %vm72_vm1, %v2602_v9 }
  0x1b   :  { %2341 = vmatprep.mubr.msk.bf16.mxu1 %vm2731_vm0, %v2730_v0  ;;  %2359 = vmatprep.mubr.msk.bf16.mxu0 %vm2731_vm0, %v2730_v0 }
  0x22   :  { %2342 = vmatmul.mubr.msk.bf16.gmra.mrb[12].mxu1 %vm72_vm1, %v2601_v8 }
  0x23   :  { %2345 = vmatprep.mubr.msk.bf16.mxu1 %vm2731_vm0, %v2730_v0 }
  0x2a   :  { %2346 = vmatmul.mubr.msk.bf16.gmra.mrb[16].mxu1 %vm72_vm1, %v2602_v9 }
  0x2b   :  { %2349 = vmatprep.mubr.msk.bf16.mxu1 %vm2731_vm0, %v2730_v0 }
  0x32   :  { %2350 = vmatmul.mubr.msk.bf16.gmra.mrb[20].mxu1 %vm72_vm1, %v2597_v4  ;;  %v2912_v4 = vsub.s32 %v331_v63, %v333_v1 }
  0x33   :  { %2353 = vmatprep.mubr.msk.bf16.mxu1 %vm2731_vm0, %v2730_v0 }
  0x3a   :  { %2354 = vmatmul.mubr.msk.bf16.gmra.mrb[24].mxu1 %vm72_vm1, %v2599_v7 }
  0x3b   :  { %2365 = vmatprep.mubr.msk.bf16.mxu1 %vm2731_vm0, %v2730_v0 }
  0xdd   :  { %v122_v12 = vpop.f32.mrb[0].mxu0  ;;  %v146_v13 = vpop.f32.mrb[0].mxu1 }
  0xde   :  { %v2839_v14 = vpack.c.bf16 %v122_v12, %v122_v12  ;;  %v2327_v15 = vpop.f32.mrb[1].mxu1  ;;  %v2315_v16 = vpop.f32.mrb[1].mxu0  ;;  %v2847_v21 = vpack.c.bf16 %v146_v13, %v146_v13 }
  0xdf   :  { %v2841_v17 = vpop.f32.mrb[2].mxu1  ;;  %v2843_v18 = vpop.f32.mrb[2].mxu0 }
  0xe0   :  { %v2328_v19 = vpop.f32.mrb[3].mxu1  ;;  %960 = vrot.lane.b32.xlu1 %v2839_v14, %s2734_s9  ;;  %v2316_v20 = vpop.f32.mrb[3].mxu0 }
  0xe4   :  { %1255 = vrot.lane.b32.xlu1 %v2847_v21, %s2734_s9 }
  0xe5   :  { %v2851_v22 = vpop.f32.mrb[4].mxu1  ;;  %v130_v23 = vpop.f32.mrb[4].mxu0 }
  0xe6   :  { %v2331_v24 = vpop.f32.mrb[5].mxu1  ;;  %v2853_v25 = vpack.c.bf16 %v130_v23, %v130_v23  ;;  %v2319_v26 = vpop.f32.mrb[5].mxu0 }
  0xe7   :  { %v2855_v27 = vpop.f32.mrb[6].mxu1  ;;  %v2857_v28 = vpop.f32.mrb[6].mxu0 }
  0xe8   :  { %v2332_v29 = vpop.f32.mrb[7].mxu1  ;;  %1059 = vrot.lane.b32.xlu0 %v2853_v25, %s2734_s9  ;;  %v2320_v30 = vpop.f32.mrb[7].mxu0 }
  0xed   :  { %v211_v31 = vpop.f32.mrb[8].mxu1  ;;  %v138_v32 = vpop.f32.mrb[8].mxu0 }
  0xee   :  { %v2339_v33 = vpop.f32.mrb[9].mxu1  ;;  %301 = vperm.xlu1 %2555, %v211_v31   ;;  %660 = vperm.xlu0 %2553, %v211_v31   ;;  %v2323_v34 = vpop.f32.mrb[9].mxu0  ;;  %v2867_v44 = vpack.c.bf16 %v138_v32, %v138_v32 }
  0xef   :  { %v214_v35 = vpop.f32.mrb[10].mxu1  ;;  %v2861_v36 = vpop.f32.mrb[10].mxu0 }
  0xf0   :  { %v2340_v37 = vpop.f32.mrb[11].mxu1  ;;  %v2324_v38 = vpop.f32.mrb[11].mxu0 }
  0xf2   :  { %2557 = vset.pattern.permute.xlu1 %v2732_v10  ;;  %2554 = vset.pattern.permute.xlu0 %v2735_v39 }
  0xf3   :  { %663 = vperm.xlu1 %2557, %v214_v35   ;;  %620 = vperm.xlu0 %2554, %v211_v31  }
  0xf5   :  { %v219_v40 = vpop.f32.mrb[12].mxu1 }
  0xf6   :  { %v2343_v41 = vpop.f32.mrb[13].mxu1 }
  0xf7   :  { %2558 = vset.pattern.permute.xlu1 %v2735_v39  ;;  %2556 = vset.pattern.permute.xlu0 %v2736_v42  ;;  %v222_v43 = vpop.f32.mrb[14].mxu1 }
  0xf8   :  { %624 = vperm.xlu1 %2558, %v214_v35   ;;  %252 = vperm.xlu0 %2556, %v211_v31   ;;  %v2344_v45 = vpop.f32.mrb[15].mxu1 }
  0xfc   :  { %2559 = vset.pattern.permute.xlu1 %v2733_v11  ;;  %1157 = vrot.lane.b32.xlu0 %v2867_v44, %s2734_s9 }
  0xfd   :  { %304 = vperm.xlu1 %2559, %v214_v35   ;;  %2563 = vset.pattern.permute.xlu0 %v2733_v11  ;;  %v227_v46 = vpop.f32.mrb[16].mxu1 }
  0xfe   :  { %v2347_v47 = vpop.f32.mrb[17].mxu1 }
  0xff   :  { %v230_v48 = vpop.f32.mrb[18].mxu1 }
 0x100   :  { %307 = vperm.xlu0 %2563, %v219_v40   ;;  %v2348_v49 = vpop.f32.mrb[19].mxu1 }
 0x101   :  { %2560 = vset.pattern.permute.xlu1 %v2736_v42 }
 0x102   :  { %257 = vperm.xlu1 %2560, %v214_v35  }
 0x104   :  { %2566 = vset.pattern.permute.xlu0 %v2735_v39 }
 0x105   :  { %632 = vperm.xlu0 %2566, %v222_v43   ;;  %v235_v50 = vpop.f32.mrb[20].mxu1 }
 0x106   :  { %2561 = vset.pattern.permute.xlu1 %v2732_v10  ;;  %v2351_v51 = vpop.f32.mrb[21].mxu1 }
 0x107   :  { %666 = vperm.xlu1 %2561, %v219_v40   ;;  %v238_v52 = vpop.f32.mrb[22].mxu1 }
 0x108   :  { %v2352_v53 = vpop.f32.mrb[23].mxu1 }
 0x109   :  { %2567 = vset.pattern.permute.xlu0 %v2733_v11 }
 0x10a   :  { %310 = vperm.xlu0 %2567, %v222_v43  }
 0x10b   :  { %2562 = vset.pattern.permute.xlu1 %v2735_v39 }
 0x10c   :  { %628 = vperm.xlu1 %2562, %v219_v40  }
 0x10d   :  { %v243_v54 = vpop.f32.mrb[24].mxu1 }
 0x10e   :  { %2570 = vset.pattern.permute.xlu0 %v2735_v39  ;;  %v2355_v55 = vpop.f32.mrb[25].mxu1 }
 0x10f   :  { %636 = vperm.xlu0 %2570, %v227_v46   ;;  %v246_v56 = vpop.f32.mrb[26].mxu1 }
 0x110   :  { %2564 = vset.pattern.permute.xlu1 %v2736_v42  ;;  %v2356_v57 = vpop.f32.mrb[27].mxu1 }
 0x111   :  { %262 = vperm.xlu1 %2564, %v219_v40  }
 0x113   :  { %2573 = vset.pattern.permute.xlu0 %v2732_v10 }
 0x114   :  { %675 = vperm.xlu0 %2573, %v230_v48  }
 0x115   :  { %2565 = vset.pattern.permute.xlu1 %v2732_v10 }
 0x116   :  { %669 = vperm.xlu1 %2565, %v222_v43  }
 0x118   :  { %2578 = vset.pattern.permute.xlu0 %v2735_v39 }
 0x119   :  { %644 = vperm.xlu0 %2578, %v235_v50  }
 0x11a   :  { %2568 = vset.pattern.permute.xlu1 %v2736_v42 }
 0x11b   :  { %267 = vperm.xlu1 %2568, %v222_v43  }
 0x11d   :  { %2580 = vset.pattern.permute.xlu0 %v2736_v42 }
 0x11e   :  { %282 = vperm.xlu0 %2580, %v235_v50  }
 0x11f   :  { %2569 = vset.pattern.permute.xlu1 %v2732_v10 }
 0x120   :  { %672 = vperm.xlu1 %2569, %v227_v46  }
 0x122   :  { %2583 = vset.pattern.permute.xlu0 %v2733_v11 }
 0x123   :  { %322 = vperm.xlu0 %2583, %v238_v52  }
 0x124   :  { %2571 = vset.pattern.permute.xlu1 %v2733_v11 }
 0x125   :  { %313 = vperm.xlu1 %2571, %v227_v46  }
 0x127   :  { %2586 = vset.pattern.permute.xlu0 %v2735_v39 }
 0x128   :  { %652 = vperm.xlu0 %2586, %v243_v54  }
 0x129   :  { %2572 = vset.pattern.permute.xlu1 %v2736_v42 }
 0x12a   :  { %272 = vperm.xlu1 %2572, %v227_v46  }
 0x12c   :  { %2587 = vset.pattern.permute.xlu0 %v2733_v11 }
 0x12d   :  { %325 = vperm.xlu0 %2587, %v243_v54  }
 0x12e   :  { %2574 = vset.pattern.permute.xlu1 %v2735_v39 }
 0x12f   :  { %640 = vperm.xlu1 %2574, %v230_v48  }
 0x131   :  { %2588 = vset.pattern.permute.xlu0 %v2736_v42 }
 0x132   :  { %292 = vperm.xlu0 %2588, %v243_v54  }
 0x133   :  { %2575 = vset.pattern.permute.xlu1 %v2733_v11 }
 0x134   :  { %316 = vperm.xlu1 %2575, %v230_v48  }
 0x136   :  { %2589 = vset.pattern.permute.xlu0 %v2732_v10 }
 0x137   :  { %687 = vperm.xlu0 %2589, %v246_v56  }
 0x138   :  { %2576 = vset.pattern.permute.xlu1 %v2736_v42 }
 0x139   :  { %277 = vperm.xlu1 %2576, %v230_v48  }
 0x13b   :  { %2590 = vset.pattern.permute.xlu0 %v2735_v39 }
 0x13c   :  { %656 = vperm.xlu0 %2590, %v246_v56  }
 0x13d   :  { %2577 = vset.pattern.permute.xlu1 %v2732_v10 }
 0x13e   :  { %678 = vperm.xlu1 %2577, %v235_v50  }
 0x140   :  { %2592 = vset.pattern.permute.xlu0 %v2736_v42 }
 0x141   :  { %297 = vperm.xlu0 %2592, %v246_v56  }
 0x142   :  { %2579 = vset.pattern.permute.xlu1 %v2733_v11 }
 0x143   :  { %319 = vperm.xlu1 %2579, %v235_v50  }
 0x145   :  { %2593 = vset.pattern.permute.xlu0 %v2732_v10 }
 0x147   :  { %2581 = vset.pattern.permute.xlu1 %v2732_v10 }
 0x148   :  { %681 = vperm.xlu1 %2581, %v238_v52  }
 0x14c   :  { %2582 = vset.pattern.permute.xlu1 %v2735_v39 }
 0x14d   :  { %648 = vperm.xlu1 %2582, %v238_v52  }
 0x151   :  { %2584 = vset.pattern.permute.xlu1 %v2736_v42 }
 0x152   :  { %287 = vperm.xlu1 %2584, %v238_v52   ;;  %v961_v58 = vpop.permute.xlu1 %960 }
 0x153   :  { %v967_v59 = vsel %vm965_vm2, %v961_v58, 0 }
 0x154   :  { %2358 = vmatpush3.bf16.msra.mxu0 %v967_v59 }
 0x155   :  { %2369 = vmatprep.subr.bf16.mxu0 %v2730_v0 }
 0x156   :  { %2585 = vset.pattern.permute.xlu1 %v2732_v10  ;;  %v2910_v62 = vpop.permute.xlu1 %1255 }
 0x157   :  { %684 = vperm.xlu1 %2585, %v243_v54  }
 0x15a   :  { %v2908_v61 = vpop.permute.xlu0 %1059 }
 0x15b   :  { %2591 = vset.pattern.permute.xlu1 %v2733_v11 }
 0x15c   :  { %328 = vperm.xlu1 %2591, %v246_v56  }
 0x16d   :  { %v302_v2 = vpop.permute.xlu1 %301  ;;  %v661_v3 = vpop.permute.xlu0 %660 }
 0x16e   :  { %v692_v5 = vrot.slane %v661_v3, %v2912_v4  ;;  %v335_v9 = vrot.slane %v302_v2, %v2912_v4 }
 0x172   :  { %v664_v6 = vpop.permute.xlu1 %663  ;;  %v621_v7 = vpop.permute.xlu0 %620 }
 0x173   :  { %v799_v8 = vadd.f32 %v692_v5, %v621_v7  ;;  %v696_v10 = vrot.slane %v664_v6, %v2912_v4 }
 0x175   :  { %v819_v13 = vmul.f32 0.2, %v799_v8  ;;  %vm809_vm3 = vcmp.gt.f32.partialorder %v799_v8, 0.0 }
 0x177   :  { %v625_v11 = vpop.permute.xlu1 %624  ;;  %v253_v12 = vpop.permute.xlu0 %252  ;;  %v2919_v24 = vsel %vm809_vm3, %v799_v8, %v819_v13 }
 0x178   :  { %v800_v15 = vadd.f32 %v696_v10, %v625_v11  ;;  %v448_v16 = vadd.f32 %v335_v9, %v253_v12  ;;  %v839_v30 = vsel %vm488_vm5, %v2919_v24, -inf }
 0x17a   :  { %v468_v19 = vmul.f32 0.2, %v448_v16  ;;  %vm458_vm4 = vcmp.gt.f32.partialorder %v448_v16, 0.0  ;;  %v820_v26 = vmul.f32 0.2, %v800_v15  ;;  %vm810_vm6 = vcmp.gt.f32.partialorder %v800_v15, 0.0 }
 0x17b   :  { %v2930_v37 = vpop.permute.xlu0 %1157 }
 0x17c   :  { %v305_v20 = vpop.permute.xlu1 %304  ;;  %v2917_v23 = vsel %vm458_vm4, %v448_v16, %v468_v19  ;;  %v2926_v32 = vsel %vm810_vm6, %v800_v15, %v820_v26 }
 0x17d   :  { %v489_v29 = vsel %vm488_vm5, %v2917_v23, -inf  ;;  %v339_v31 = vrot.slane %v305_v20, %v2912_v4  ;;  %v842_v35 = vsel %vm488_vm5, %v2926_v32, -inf }
 0x17e   :  { %490 = vmax.xlane.f32.xlu0 %v489_v29 }
 0x17f   :  { %v308_v42 = vpop.permute.xlu0 %307 }
 0x180   :  { %840 = vmax.xlane.f32.xlu1 %v839_v30  ;;  %v343_v48 = vrot.slane %v308_v42, %v2912_v4 }
 0x181   :  { %v258_v33 = vpop.permute.xlu1 %257 }
 0x182   :  { %v449_v34 = vadd.f32 %v339_v31, %v258_v33 }
 0x184   :  { %843 = vmax.xlane.f32.xlu1 %v842_v35  ;;  %vm459_vm7 = vcmp.gt.f32.partialorder %v449_v34, 0.0  ;;  %v469_v38 = vmul.f32 0.2, %v449_v34  ;;  %v633_v49 = vpop.permute.xlu0 %632 }
 0x186   :  { %v667_v39 = vpop.permute.xlu1 %666  ;;  %v2932_v40 = vsel %vm459_vm7, %v449_v34, %v469_v38 }
 0x187   :  { %v492_v41 = vsel %vm488_vm5, %v2932_v40, -inf  ;;  %v700_v43 = vrot.slane %v667_v39, %v2912_v4 }
 0x188   :  { %493 = vmax.xlane.f32.xlu1 %v492_v41 }
 0x189   :  { %v311_v57 = vpop.permute.xlu0 %310 }
 0x18a   :  { %v347_v63 = vrot.slane %v311_v57, %v2912_v4 }
 0x18b   :  { %v629_v45 = vpop.permute.xlu1 %628 }
 0x18c   :  { %v801_v46 = vadd.f32 %v700_v43, %v629_v45 }
 0x18e   :  { %vm811_vm8 = vcmp.gt.f32.partialorder %v801_v46, 0.0  ;;  %v821_v47 = vmul.f32 0.2, %v801_v46  ;;  %v637_v12 = vpop.permute.xlu0 %636 }
 0x190   :  { %v263_v50 = vpop.permute.xlu1 %262  ;;  %v2938_v51 = vsel %vm811_vm8, %v801_v46, %v821_v47 }
 0x191   :  { %v450_v52 = vadd.f32 %v343_v48, %v263_v50  ;;  %v845_v53 = vsel %vm488_vm5, %v2938_v51, -inf }
 0x192   :  { %846 = vmax.xlane.f32.xlu0 %v845_v53 }
 0x193   :  { %vm460_vm9 = vcmp.gt.f32.partialorder %v450_v52, 0.0  ;;  %v470_v54 = vmul.f32 0.2, %v450_v52  ;;  %v676_v30 = vpop.permute.xlu0 %675 }
 0x194   :  { %v712_v34 = vrot.slane %v676_v30, %v2912_v4 }
 0x195   :  { %v670_v55 = vpop.permute.xlu1 %669  ;;  %v2942_v56 = vsel %vm460_vm9, %v450_v52, %v470_v54 }
 0x196   :  { %v704_v58 = vrot.slane %v670_v55, %v2912_v4  ;;  %v495_v59 = vsel %vm488_vm5, %v2942_v56, -inf }
 0x197   :  { %496 = vmax.xlane.f32.xlu1 %v495_v59 }
 0x198   :  { %v802_v60 = vadd.f32 %v704_v58, %v633_v49  ;;  %v645_v54 = vpop.permute.xlu0 %644 }
 0x19a   :  { %v268_v1 = vpop.permute.xlu1 %267  ;;  %vm812_vm10 = vcmp.gt.f32.partialorder %v802_v60, 0.0  ;;  %v822_v2 = vmul.f32 0.2, %v802_v60 }
 0x19b   :  { %v451_v3 = vadd.f32 %v347_v63, %v268_v1 }
 0x19c   :  { %v2948_v5 = vsel %vm812_vm10, %v802_v60, %v822_v2 }
 0x19d   :  { %v848_v6 = vsel %vm488_vm5, %v2948_v5, -inf  ;;  %vm461_vm11 = vcmp.gt.f32.partialorder %v451_v3, 0.0  ;;  %v471_v7 = vmul.f32 0.2, %v451_v3  ;;  %v283_v1 = vpop.permute.xlu0 %282 }
 0x19e   :  { %849 = vmax.xlane.f32.xlu1 %v848_v6 }
 0x19f   :  { %v673_v8 = vpop.permute.xlu1 %672  ;;  %v2952_v9 = vsel %vm461_vm11, %v451_v3, %v471_v7 }
 0x1a0   :  { %v708_v10 = vrot.slane %v673_v8, %v2912_v4  ;;  %v498_v11 = vsel %vm488_vm5, %v2952_v9, -inf }
 0x1a2   :  { %v803_v13 = vadd.f32 %v708_v10, %v637_v12  ;;  %499 = vmax.xlane.f32.xlu1 %v498_v11 }
 0x1a4   :  { %v314_v15 = vpop.permute.xlu1 %313  ;;  %vm813_vm12 = vcmp.gt.f32.partialorder %v803_v13, 0.0  ;;  %v823_v16 = vmul.f32 0.2, %v803_v13 }
 0x1a5   :  { %v351_v26 = vrot.slane %v314_v15, %v2912_v4  ;;  %v323_v15 = vpop.permute.xlu0 %322 }
 0x1a6   :  { %v2957_v19 = vsel %vm813_vm12, %v803_v13, %v823_v16 }
 0x1a7   :  { %v851_v20 = vsel %vm488_vm5, %v2957_v19, -inf }
 0x1a8   :  { %852 = vmax.xlane.f32.xlu1 %v851_v20 }
 0x1a9   :  { %v273_v29 = vpop.permute.xlu1 %272 }
 0x1aa   :  { %v452_v31 = vadd.f32 %v351_v26, %v273_v29  ;;  %v363_v26 = vrot.slane %v323_v15, %v2912_v4 }
 0x1ac   :  { %vm462_vm13 = vcmp.gt.f32.partialorder %v452_v31, 0.0  ;;  %v472_v33 = vmul.f32 0.2, %v452_v31 }
 0x1ae   :  { %v641_v35 = vpop.permute.xlu1 %640  ;;  %v2963_v38 = vsel %vm462_vm13, %v452_v31, %v472_v33 }
 0x1af   :  { %v804_v39 = vadd.f32 %v712_v34, %v641_v35  ;;  %v501_v41 = vsel %vm488_vm5, %v2963_v38, -inf  ;;  %v653_v34 = vpop.permute.xlu0 %652 }
 0x1b0   :  { %502 = vmax.xlane.f32.xlu1 %v501_v41 }
 0x1b1   :  { %vm814_vm14 = vcmp.gt.f32.partialorder %v804_v39, 0.0  ;;  %v824_v42 = vmul.f32 0.2, %v804_v39 }
 0x1b3   :  { %v317_v43 = vpop.permute.xlu1 %316  ;;  %v2967_v45 = vsel %vm814_vm14, %v804_v39, %v824_v42 }
 0x1b4   :  { %v854_v46 = vsel %vm488_vm5, %v2967_v45, -inf  ;;  %v355_v47 = vrot.slane %v317_v43, %v2912_v4 }
 0x1b5   :  { %855 = vmax.xlane.f32.xlu1 %v854_v46 }
 0x1b8   :  { %v278_v48 = vpop.permute.xlu1 %277 }
 0x1b9   :  { %v453_v49 = vadd.f32 %v355_v47, %v278_v48  ;;  %v2999_v47 = vpack.c.bf16 %v2843_v18, %v2843_v18  ;;  %v326_v48 = vpop.permute.xlu0 %325  ;;  %v3010_v18 = vpack.c.bf16 %v2851_v22, %v2851_v22 }
 0x1bb   :  { %v473_v50 = vmul.f32 0.2, %v453_v49  ;;  %vm463_vm15 = vcmp.gt.f32.partialorder %v453_v49, 0.0 }
 0x1bd   :  { %v679_v52 = vpop.permute.xlu1 %678  ;;  %v2972_v53 = vsel %vm463_vm15, %v453_v49, %v473_v50 }
 0x1be   :  { %v716_v55 = vrot.slane %v679_v52, %v2912_v4  ;;  %v504_v57 = vsel %vm488_vm5, %v2972_v53, -inf }
 0x1bf   :  { %505 = vmax.xlane.f32.xlu1 %v504_v57  ;;  %v367_v57 = vrot.slane %v326_v48, %v2912_v4 }
 0x1c0   :  { %v805_v58 = vadd.f32 %v716_v55, %v645_v54  ;;  %v293_v54 = vpop.permute.xlu0 %292 }
 0x1c2   :  { %v320_v59 = vpop.permute.xlu1 %319  ;;  %vm815_vm3 = vcmp.gt.f32.partialorder %v805_v58, 0.0  ;;  %v825_v60 = vmul.f32 0.2, %v805_v58 }
 0x1c3   :  { %v359_v63 = vrot.slane %v320_v59, %v2912_v4 }
 0x1c4   :  { %v2978_v2 = vsel %vm815_vm3, %v805_v58, %v825_v60  ;;  %v688_v55 = vpop.permute.xlu0 %687  ;;  %v456_v60 = vadd.f32 %v367_v57, %v293_v54 }
 0x1c5   :  { %v454_v3 = vadd.f32 %v359_v63, %v283_v1  ;;  %v857_v6 = vsel %vm488_vm5, %v2978_v2, -inf }
 0x1c6   :  { %858 = vmax.xlane.f32.xlu0 %v857_v6  ;;  %vm466_vm9 = vcmp.gt.f32.partialorder %v456_v60, 0.0 }
 0x1c7   :  { %v682_v7 = vpop.permute.xlu1 %681  ;;  %vm464_vm4 = vcmp.gt.f32.partialorder %v454_v3, 0.0  ;;  %v474_v8 = vmul.f32 0.2, %v454_v3 }
 0x1c8   :  { %v720_v12 = vrot.slane %v682_v7, %v2912_v4  ;;  %v657_v58 = vpop.permute.xlu0 %656 }
 0x1c9   :  { %v2982_v10 = vsel %vm464_vm4, %v454_v3, %v474_v8  ;;  %v476_v3 = vmul.f32 0.2, %v456_v60 }
 0x1ca   :  { %v507_v11 = vsel %vm488_vm5, %v2982_v10, -inf }
 0x1cb   :  { %508 = vmax.xlane.f32.xlu1 %v507_v11  ;;  %v3015_v7 = vsel %vm466_vm9, %v456_v60, %v476_v3 }
 0x1cc   :  { %v649_v13 = vpop.permute.xlu1 %648  ;;  %v298_v1 = vpop.permute.xlu0 %297  ;;  %v513_v11 = vsel %vm488_vm5, %v3015_v7, -inf }
 0x1cd   :  { %v806_v16 = vadd.f32 %v720_v12, %v649_v13  ;;  %v728_v13 = vrot.slane %v688_v55, %v2912_v4 }
 0x1cf   :  { %v826_v20 = vmul.f32 0.2, %v806_v16  ;;  %vm816_vm6 = vcmp.gt.f32.partialorder %v806_v16, 0.0  ;;  %v808_v15 = vadd.f32 %v728_v13, %v657_v58 }
 0x1d1   :  { %v288_v29 = vpop.permute.xlu1 %287  ;;  %v2988_v30 = vsel %vm816_vm6, %v806_v16, %v826_v20  ;;  %v828_v20 = vmul.f32 0.2, %v808_v15  ;;  %vm818_vm11 = vcmp.gt.f32.partialorder %v808_v15, 0.0 }
 0x1d2   :  { %v455_v31 = vadd.f32 %v363_v26, %v288_v29  ;;  %v860_v33 = vsel %vm488_vm5, %v2988_v30, -inf }
 0x1d3   :  { %861 = vmax.xlane.f32.xlu1 %v860_v33 }
 0x1d4   :  { %v475_v35 = vmul.f32 0.2, %v455_v31  ;;  %vm465_vm7 = vcmp.gt.f32.partialorder %v455_v31, 0.0 }
 0x1d6   :  { %v685_v39 = vpop.permute.xlu1 %684  ;;  %v2992_v41 = vsel %vm465_vm7, %v455_v31, %v475_v35  ;;  %v3026_v35 = vsel %vm818_vm11, %v808_v15, %v828_v20 }
 0x1d7   :  { %v724_v42 = vrot.slane %v685_v39, %v2912_v4  ;;  %v510_v43 = vsel %vm488_vm5, %v2992_v41, -inf }
 0x1d8   :  { %511 = vmax.xlane.f32.xlu1 %v510_v43 }
 0x1d9   :  { %v807_v46 = vadd.f32 %v724_v42, %v653_v34 }
 0x1db   :  { %vm817_vm8 = vcmp.gt.f32.partialorder %v807_v46, 0.0  ;;  %v827_v49 = vmul.f32 0.2, %v807_v46  ;;  %v329_v59 = vpop.permute.xlu1 %328 }
 0x1dc   :  { %1010 = vrot.lane.b32.xlu0 %v2999_v47, %s2734_s9  ;;  %v371_v63 = vrot.slane %v329_v59, %v2912_v4  ;;  %v866_v4 = vsel %vm488_vm5, %v3026_v35, -inf }
 0x1dd   :  { %v3003_v50 = vsel %vm817_vm8, %v807_v46, %v827_v49 }
 0x1de   :  { %v863_v52 = vsel %vm488_vm5, %v3003_v50, -inf  ;;  %v457_v6 = vadd.f32 %v371_v63, %v298_v1 }
 0x1df   :  { %864 = vmax.xlane.f32.xlu1 %v863_v52 }
 0x1e0   :  { %v477_v8 = vmul.f32 0.2, %v457_v6  ;;  %vm467_vm10 = vcmp.gt.f32.partialorder %v457_v6, 0.0 }
 0x1e2   :  { %v3019_v22 = vsel %vm467_vm10, %v457_v6, %v477_v8 }
 0x1e3   :  { %v516_v12 = vsel %vm488_vm5, %v3019_v22, -inf }
 0x1f0   :  { %1353 = vrot.lane.b32.xlu1 %v3010_v18, %s2734_s9 }
 0x1fb   :  { %514 = vmax.xlane.f32.xlu0 %v513_v11 }
 0x1ff   :  { %517 = vmax.xlane.f32.xlu0 %v516_v12 }
 0x20b   :  { %v491_v16 = vpop.xlane.xlu0 %490 }
 0x20c   :  { %v519_v26 = vsub.f32 %v2917_v23, %v491_v16 }
 0x20d   :  { %v841_v29 = vpop.xlane.xlu1 %840 }
 0x20e   :  { %v869_v31 = vsub.f32 %v2919_v24, %v841_v29  ;;  %v529_v33 = vmul.f32 1.442695, %v519_v26 }
 0x210   :  { %v879_v34 = vmul.f32 1.442695, %v869_v31 }
 0x211   :  { %v844_v39 = vpop.xlane.xlu1 %843 }
 0x212   :  { %2605 = vpow2.f32 %v879_v34  ;;  %v870_v42 = vsub.f32 %v2926_v32, %v844_v39 }
 0x213   :  { %2607 = vpow2.f32 %v529_v33 }
 0x214   :  { %v881_v43 = vmul.f32 1.442695, %v870_v42  ;;  %867 = vmax.xlane.f32.xlu1 %v866_v4 }
 0x215   :  { %v3039_v52 = vpop.xlane.xlu1 %493 }
 0x216   :  { %2609 = vpow2.f32 %v881_v43 }
 0x21c   :  { %v3031_v23 = vpop.eup %2605 }
 0x21d   :  { %v899_v24 = vsel %vm488_vm5, %v3031_v23, 0.0  ;;  %v3035_v46 = vpop.eup %2607 }
 0x21e   :  { %900 = vadd.xlane.f32.xlu1 %v899_v24  ;;  %v549_v55 = vsel %vm488_vm5, %v3035_v46, 0.0 }
 0x21f   :  { %v847_v48 = vpop.xlane.xlu0 %846 }
 0x220   :  { %v3037_v49 = vpop.eup %2609  ;;  %v871_v32 = vsub.f32 %v2938_v51, %v847_v48  ;;  %v3080_v48 = vpack.c.bf16 %v2857_v28, %v2857_v28 }
 0x221   :  { %v902_v54 = vsel %vm488_vm5, %v3037_v49, 0.0 }
 0x222   :  { %v883_v57 = vmul.f32 1.442695, %v871_v32  ;;  %903 = vadd.xlane.f32.xlu0 %v902_v54  ;;  %550 = vadd.xlane.f32.xlu1 %v549_v55 }
 0x224   :  { %2611 = vpow2.f32 %v883_v57  ;;  %v497_v58 = vpop.xlane.xlu1 %496 }
 0x225   :  { %v521_v59 = vsub.f32 %v2942_v56, %v497_v58 }
 0x227   :  { %v533_v60 = vmul.f32 1.442695, %v521_v59 }
 0x229   :  { %2613 = vpow2.f32 %v533_v60 }
 0x22b   :  { %v850_v63 = vpop.xlane.xlu1 %849 }
 0x22c   :  { %v872_v1 = vsub.f32 %v2948_v5, %v850_v63 }
 0x22e   :  { %v3048_v3 = vpop.eup %2611  ;;  %v885_v51 = vmul.f32 1.442695, %v872_v1  ;;  %v520_v1 = vsub.f32 %v2932_v40, %v3039_v52 }
 0x22f   :  { %v905_v6 = vsel %vm488_vm5, %v3048_v3, 0.0  ;;  %v3052_v8 = vpop.xlane.xlu1 %499 }
 0x230   :  { %2615 = vpow2.f32 %v885_v51  ;;  %906 = vadd.xlane.f32.xlu1 %v905_v6 }
 0x233   :  { %v3054_v11 = vpop.eup %2613 }
 0x234   :  { %v555_v56 = vsel %vm488_vm5, %v3054_v11, 0.0 }
 0x235   :  { %v853_v12 = vpop.xlane.xlu1 %852  ;;  %556 = vadd.xlane.f32.xlu1 %v555_v56  ;;  %v531_v56 = vmul.f32 1.442695, %v520_v1 }
 0x236   :  { %v873_v13 = vsub.f32 %v2957_v19, %v853_v12 }
 0x238   :  { %v887_v5 = vmul.f32 1.442695, %v873_v13 }
 0x23a   :  { %v3059_v15 = vpop.eup %2615  ;;  %2617 = vpow2.f32 %v887_v5 }
 0x23b   :  { %v908_v16 = vsel %vm488_vm5, %v3059_v15, 0.0 }
 0x23c   :  { %909 = vadd.xlane.f32.xlu0 %v908_v16 }
 0x23d   :  { %v503_v20 = vpop.xlane.xlu1 %502 }
 0x23e   :  { %v523_v26 = vsub.f32 %v2963_v38, %v503_v20 }
 0x240   :  { %v537_v29 = vmul.f32 1.442695, %v523_v26 }
 0x242   :  { %2619 = vpow2.f32 %v537_v29  ;;  %v856_v31 = vpop.xlane.xlu1 %855 }
 0x243   :  { %v874_v33 = vsub.f32 %v2967_v45, %v856_v31  ;;  %v3117_v31 = vpack.c.bf16 %v2861_v36, %v2861_v36 }
 0x244   :  { %v3065_v34 = vpop.eup %2617 }
 0x245   :  { %v889_v39 = vmul.f32 1.442695, %v874_v33  ;;  %v911_v19 = vsel %vm488_vm5, %v3065_v34, 0.0  ;;  %v522_v33 = vsub.f32 %v2952_v9, %v3052_v8 }
 0x246   :  { %912 = vadd.xlane.f32.xlu1 %v911_v19 }
 0x247   :  { %2621 = vpow2.f32 %v889_v39 }
 0x24c   :  { %v3069_v42 = vpop.eup %2619  ;;  %v3084_v55 = vpop.xlane.xlu1 %505 }
 0x24d   :  { %v561_v4 = vsel %vm488_vm5, %v3069_v42, 0.0 }
 0x24e   :  { %562 = vadd.xlane.f32.xlu0 %v561_v4  ;;  %v535_v4 = vmul.f32 1.442695, %v522_v33 }
 0x251   :  { %v3073_v38 = vpop.eup %2621 }
 0x252   :  { %v914_v43 = vsel %vm488_vm5, %v3073_v38, 0.0 }
 0x253   :  { %915 = vadd.xlane.f32.xlu0 %v914_v43  ;;  %v859_v45 = vpop.xlane.xlu0 %858 }
 0x254   :  { %v875_v24 = vsub.f32 %v2978_v2, %v859_v45 }
 0x256   :  { %v891_v32 = vmul.f32 1.442695, %v875_v24 }
 0x257   :  { %1108 = vrot.lane.b32.xlu1 %v3080_v48, %s2734_s9  ;;  %v1011_v54 = vpop.permute.xlu0 %1010 }
 0x258   :  { %2623 = vpow2.f32 %v891_v32  ;;  %v1016_v57 = vsel %vm965_vm2, %v1011_v54, 0  ;;  %v509_v58 = vpop.xlane.xlu1 %508 }
 0x259   :  { %2364 = vmatpush3.bf16.msra.mxu1 %v1016_v57  ;;  %v525_v51 = vsub.f32 %v2982_v10, %v509_v58 }
 0x25a   :  { %2375 = vmatprep.subr.bf16.mxu1 %v2730_v0 }
 0x25b   :  { %v541_v12 = vmul.f32 1.442695, %v525_v51 }
 0x260   :  { %v862_v59 = vpop.xlane.xlu1 %861 }
 0x261   :  { %v876_v2 = vsub.f32 %v2988_v30, %v862_v59 }
 0x262   :  { %v3089_v60 = vpop.eup %2623 }
 0x263   :  { %v893_v28 = vmul.f32 1.442695, %v876_v2  ;;  %v917_v63 = vsel %vm488_vm5, %v3089_v60, 0.0 }
 0x264   :  { %918 = vadd.xlane.f32.xlu0 %v917_v63 }
 0x265   :  { %2625 = vpow2.f32 %v893_v28  ;;  %v3096_v6 = vpop.xlane.xlu1 %511 }
 0x266   :  { %2627 = vpow2.f32 %v531_v56 }
 0x267   :  { %2629 = vpow2.f32 %v541_v12  ;;  %v1065_v12 = vsel %vm965_vm2, %v2908_v61, 0 }
 0x26c   :  { %v865_v13 = vpop.xlane.xlu1 %864 }
 0x26d   :  { %v877_v30 = vsub.f32 %v3003_v50, %v865_v13 }
 0x26f   :  { %v3099_v5 = vpop.eup %2625  ;;  %v895_v16 = vmul.f32 1.442695, %v877_v30 }
 0x270   :  { %v920_v20 = vsel %vm488_vm5, %v3099_v5, 0.0  ;;  %v3103_v40 = vpop.eup %2627  ;;  %v3123_v39 = vpop.permute.xlu1 %1353 }
 0x271   :  { %2631 = vpow2.f32 %v895_v16  ;;  %921 = vadd.xlane.f32.xlu0 %v920_v20  ;;  %v3105_v10 = vpop.eup %2629  ;;  %v552_v52 = vsel %vm488_vm5, %v3103_v40, 0.0 }
 0x272   :  { %v567_v29 = vsel %vm488_vm5, %v3105_v10, 0.0  ;;  %2633 = vpow2.f32 %v535_v4 }
 0x27b   :  { %v3109_v26 = vpop.eup %2631  ;;  %553 = vadd.xlane.f32.xlu1 %v552_v52  ;;  %v3161_v52 = vpack.c.bf16 %v2855_v27, %v2855_v27  ;;  %v524_v27 = vsub.f32 %v2972_v53, %v3084_v55  ;;  %v1261_v55 = vsel %vm965_vm2, %v2910_v62, 0 }
 0x27c   :  { %v923_v50 = vsel %vm488_vm5, %v3109_v26, 0.0  ;;  %v3127_v58 = vpop.eup %2633 }
 0x27d   :  { %924 = vadd.xlane.f32.xlu0 %v923_v50 }
 0x27f   :  { %568 = vadd.xlane.f32.xlu1 %v567_v29 }
 0x288   :  { %v515_v19 = vpop.xlane.xlu0 %514 }
 0x289   :  { %v527_v43 = vsub.f32 %v3015_v7, %v515_v19  ;;  %v526_v19 = vsub.f32 %v2992_v41, %v3096_v6 }
 0x28b   :  { %v545_v32 = vmul.f32 1.442695, %v527_v43 }
 0x28c   :  { %v518_v36 = vpop.xlane.xlu0 %517 }
 0x28d   :  { %v528_v4 = vsub.f32 %v3019_v22, %v518_v36 }
 0x293   :  { %1206 = vrot.lane.b32.xlu0 %v3117_v31, %s2734_s9 }
 0x2a1   :  { %v868_v45 = vpop.xlane.xlu1 %867 }
 0x2a2   :  { %v878_v24 = vsub.f32 %v3026_v35, %v868_v45  ;;  %v558_v35 = vsel %vm488_vm5, %v3127_v58, 0.0 }
 0x2a4   :  { %v897_v54 = vmul.f32 1.442695, %v878_v24  ;;  %v543_v24 = vmul.f32 1.442695, %v526_v19 }
 0x2a6   :  { %2635 = vpow2.f32 %v897_v54  ;;  %v547_v54 = vmul.f32 1.442695, %v528_v4 }
 0x2a7   :  { %2637 = vpow2.f32 %v545_v32 }
 0x2ab   :  { %v901_v57 = vpop.xlane.xlu1 %900 }
 0x2ac   :  { %2639 = vrcp.f32 %v901_v57 }
 0x2af   :  { %v904_v9 = vpop.xlane.xlu0 %903  ;;  %v3140_v51 = vpop.xlane.xlu1 %550 }
 0x2b0   :  { %v3129_v8 = vpop.eup %2635  ;;  %2641 = vrcp.f32 %v904_v9 }
 0x2b1   :  { %v926_v7 = vsel %vm488_vm5, %v3129_v8, 0.0  ;;  %v3135_v59 = vpop.eup %2637 }
 0x2b2   :  { %927 = vadd.xlane.f32.xlu1 %v926_v7  ;;  %559 = vadd.xlane.f32.xlu0 %v558_v35  ;;  %v573_v2 = vsel %vm488_vm5, %v3135_v59, 0.0 }
 0x2b6   :  { %v2640_v28 = vpop.eup %2639  ;;  %574 = vadd.xlane.f32.xlu0 %v573_v2 }
 0x2b7   :  { %v939_v63 = vmul.f32 %v2640_v28, %v3031_v23  ;;  %v3152_v23 = vpack.c.bf16 %v2841_v17, %v2841_v17  ;;  %v1163_v17 = vsel %vm965_vm2, %v2930_v37, 0  ;;  %v539_v37 = vmul.f32 1.442695, %v524_v27 }
 0x2b9   :  { %v949_v1 = vpack.c.bf16 %v939_v63, %v939_v63 }
 0x2ba   :  { %v2642_v56 = vpop.eup %2641 }
 0x2bb   :  { %2360 = vmatmul.mubr.msk.bf16.vlgmr.msra.gmra.mrb[12].mxu0 %vm488_vm5, %v949_v1  ;;  %v940_v13 = vmul.f32 %v2642_v56, %v3037_v49  ;;  %v1359_v56 = vsel %vm965_vm2, %v3123_v39, 0 }
 0x2bc   :  { %2370 = vmatpush3.bf16.msra.mxu0 %v1065_v12  ;;  %2371 = vmatprep.mubr.msk.bf16.mxu0 %vm2731_vm0, %v2730_v0 }
 0x2bd   :  { %v907_v30 = vpop.xlane.xlu1 %906  ;;  %2381 = vmatprep.subr.bf16.mxu0 %v2730_v0  ;;  %v950_v16 = vpack.c.bf16 %v940_v13, %v940_v13 }
 0x2be   :  { %2643 = vrcp.f32 %v907_v30 }
 0x2bf   :  { %2366 = vmatmul.mubr.msk.bf16.vlgmr.msra.gmra.mrb[28].mxu1 %vm488_vm5, %v950_v16 }
 0x2c0   :  { %2377 = vmatprep.mubr.msk.bf16.mxu1 %vm2731_vm0, %v2730_v0 }
 0x2c3   :  { %1304 = vrot.lane.b32.xlu1 %v3152_v23, %s2734_s9 }
 0x2c8   :  { %v2644_v61 = vpop.eup %2643 }
 0x2c9   :  { %v941_v49 = vmul.f32 %v2644_v61, %v3048_v3  ;;  %v910_v20 = vpop.xlane.xlu0 %909  ;;  %v3170_v3 = vpop.xlane.xlu1 %556 }
 0x2ca   :  { %2645 = vrcp.f32 %v910_v20 }
 0x2cb   :  { %v951_v50 = vpack.c.bf16 %v941_v49, %v941_v49 }
 0x2cc   :  { %1402 = vrot.lane.b32.xlu0 %v3161_v52, %s2734_s9 }
 0x2cd   :  { %2372 = vmatmul.mubr.msk.bf16.vlgmr.msra.gmra.mrb[16].mxu0 %vm488_vm5, %v951_v50 }
 0x2ce   :  { %2382 = vmatpush3.bf16.msra.mxu0 %v1163_v17  ;;  %2383 = vmatprep.mubr.msk.bf16.mxu0 %vm2731_vm0, %v2730_v0 }
 0x2cf   :  { %2393 = vmatprep.subr.bf16.mxu0 %v2730_v0 }
 0x2d3   :  { %v913_v29 = vpop.xlane.xlu1 %912 }
 0x2d4   :  { %v2646_v33 = vpop.eup %2645  ;;  %2647 = vrcp.f32 %v913_v29 }
 0x2d5   :  { %v942_v43 = vmul.f32 %v2646_v33, %v3059_v15  ;;  %2649 = vpow2.f32 %v539_v37  ;;  %v1638_v37 = vsel %vm965_vm2, %v2867_v44, 0 }
 0x2d6   :  { %2651 = vpow2.f32 %v543_v24 }
 0x2d7   :  { %v1109_v45 = vpop.permute.xlu1 %1108  ;;  %v952_v57 = vpack.c.bf16 %v942_v43, %v942_v43  ;;  %2653 = vpow2.f32 %v547_v54  ;;  %v1730_v43 = vsel %vm965_vm2, %v2847_v21, 0 }
 0x2d8   :  { %v1114_v32 = vsel %vm965_vm2, %v1109_v45, 0 }
 0x2d9   :  { %2376 = vmatpush3.bf16.msra.mxu1 %v1114_v32 }
 0x2da   :  { %2387 = vmatprep.subr.bf16.mxu1 %v2730_v0 }
 0x2db   :  { %v563_v9 = vpop.xlane.xlu0 %562 }
 0x2dc   :  { %2378 = vmatmul.mubr.msk.bf16.vlgmr.msra.gmra.mrb[32].mxu1 %vm488_vm5, %v952_v57 }
 0x2dd   :  { %2389 = vmatprep.mubr.msk.bf16.mxu1 %vm2731_vm0, %v2730_v0 }
 0x2de   :  { %v2648_v53 = vpop.eup %2647 }
 0x2df   :  { %v943_v41 = vmul.f32 %v2648_v53, %v3065_v34  ;;  %v3185_v15 = vpop.eup %2649 }
 0x2e0   :  { %v3193_v6 = vpop.eup %2651  ;;  %v564_v36 = vsel %vm488_vm5, %v3185_v15, 0.0  ;;  %v916_v35 = vpop.xlane.xlu0 %915 }
 0x2e1   :  { %v953_v22 = vpack.c.bf16 %v943_v41, %v943_v41  ;;  %v3197_v34 = vpop.eup %2653  ;;  %v570_v7 = vsel %vm488_vm5, %v3193_v6, 0.0 }
 0x2e2   :  { %v576_v62 = vsel %vm488_vm5, %v3197_v34, 0.0 }
 0x2e3   :  { %2384 = vmatmul.mubr.msk.bf16.vlgmr.msra.gmra.mrb[20].mxu0 %vm488_vm5, %v953_v22 }
 0x2e4   :  { %2394 = vmatpush3.bf16.msra.mxu0 %v1261_v55  ;;  %2395 = vmatprep.mubr.msk.bf16.mxu0 %vm2731_vm0, %v2730_v0 }
 0x2e5   :  { %2405 = vmatprep.subr.bf16.mxu0 %v2730_v0 }
 0x2e7   :  { %565 = vadd.xlane.f32.xlu1 %v564_v36 }
 0x2eb   :  { %577 = vadd.xlane.f32.xlu1 %v576_v62  ;;  %571 = vadd.xlane.f32.xlu0 %v570_v7 }
 0x2f1   :  { %v919_v2 = vpop.xlane.xlu0 %918 }
 0x2f2   :  { %2655 = vrcp.f32 %v919_v2  ;;  %v2603_v2 = vld [vmem:[%s3444_s3] sm:$0xff]  }
 0x2f3   :  { %2657 = vrcp.f32 %v916_v35  ;;  %v1500_v35 = vsel %vm965_vm2, %v2999_v47, 0  ;;  %v2604_v47 = vld [vmem:[%s3444_s3 + $0x8] sm:$0xff]  }
 0x2fc   :  { %v2656_v28 = vpop.eup %2655 }
 0x2fd   :  { %v945_v63 = vmul.f32 %v2656_v28, %v3089_v60  ;;  %v2658_v13 = vpop.eup %2657 }
 0x2fe   :  { %v922_v12 = vpop.xlane.xlu0 %921  ;;  %v944_v16 = vmul.f32 %v2658_v13, %v3073_v38  ;;  %v2728_v13 = vld [vmem:[%s3442_s0 + $0x18] sm:$0xff]  }
 0x2ff   :  { %v955_v1 = vpack.c.bf16 %v945_v63, %v945_v63 }
 0x300   :  { %v954_v39 = vpack.c.bf16 %v944_v16, %v944_v16 }
 0x301   :  { %2396 = vmatmul.mubr.msk.bf16.vlgmr.msra.gmra.mrb[24].mxu0 %vm488_vm5, %v955_v1  ;;  %v1592_v1 = vsel %vm965_vm2, %v3080_v48, 0 }
 0x302   :  { %2406 = vmatpush3.bf16.msra.mxu0 %v1359_v56  ;;  %2407 = vmatprep.mubr.msk.bf16.mxu0 %vm2731_vm0, %v2730_v0  ;;  %v2725_v56 = vld [vmem:[%s3442_s0] sm:$0xff]  }
 0x303   :  { %2417 = vmatprep.subr.bf16.mxu0 %v2730_v0 }
 0x308   :  { %v554_v27 = vpop.xlane.xlu1 %553 }
 0x30a   :  { %v925_v30 = vpop.xlane.xlu0 %924 }
 0x30b   :  { %2659 = vrcp.f32 %v925_v30 }
 0x30c   :  { %2661 = vrcp.f32 %v3140_v51  ;;  %v1454_v51 = vsel %vm965_vm2, %v2839_v14, 0  ;;  %v569_v33 = vpop.xlane.xlu1 %568 }
 0x30d   :  { %2663 = vrcp.f32 %v3170_v3  ;;  %v1546_v3 = vsel %vm965_vm2, %v2853_v25, 0 }
 0x30e   :  { %v1207_v60 = vpop.permute.xlu0 %1206  ;;  %2665 = vrcp.f32 %v563_v9 }
 0x30f   :  { %v1212_v61 = vsel %vm965_vm2, %v1207_v60, 0  ;;  %2667 = vrcp.f32 %v569_v33  ;;  %v2729_v60 = vld [vmem:[%s3442_s0 + $0x20] sm:$0xff]  }
 0x310   :  { %2388 = vmatpush3.bf16.msra.mxu1 %v1212_v61  ;;  %2669 = vrcp.f32 %v922_v12  ;;  %v1684_v12 = vsel %vm965_vm2, %v3117_v31, 0  ;;  %v2727_v31 = vld [vmem:[%s3442_s0 + $0x10] sm:$0xff]  }
 0x311   :  { %2399 = vmatprep.subr.bf16.mxu1 %v2730_v0 }
 0x313   :  { %2390 = vmatmul.mubr.msk.bf16.vlgmr.msra.gmra.mrb[36].mxu1 %vm488_vm5, %v954_v39 }
 0x314   :  { %2401 = vmatprep.mubr.msk.bf16.mxu1 %vm2731_vm0, %v2730_v0 }
 0x315   :  { %v2660_v49 = vpop.eup %2659 }
 0x316   :  { %v947_v20 = vmul.f32 %v2660_v49, %v3109_v26  ;;  %v2662_v50 = vpop.eup %2661 }
 0x317   :  { %v589_v17 = vmul.f32 %v2662_v50, %v3035_v46  ;;  %v2664_v29 = vpop.eup %2663  ;;  %v1776_v50 = vsel %vm965_vm2, %v3152_v23, 0 }
 0x318   :  { %v957_v38 = vpack.c.bf16 %v947_v20, %v947_v20  ;;  %v591_v14 = vmul.f32 %v2664_v29, %v3054_v11  ;;  %v2666_v19 = vpop.eup %2665 }
 0x319   :  { %v599_v26 = vpack.c.bf16 %v589_v17, %v589_v17  ;;  %v593_v25 = vmul.f32 %v2666_v19, %v3069_v42  ;;  %v2668_v4 = vpop.eup %2667  ;;  %v1822_v42 = vsel %vm965_vm2, %v3010_v18, 0 }
 0x31a   :  { %2408 = vmatmul.mubr.msk.bf16.vlgmr.msra.gmra.mrb[28].mxu0 %vm488_vm5, %v957_v38  ;;  %v601_v46 = vpack.c.bf16 %v591_v14, %v591_v14  ;;  %v595_v44 = vmul.f32 %v2668_v4, %v3105_v10  ;;  %v2670_v21 = vpop.eup %2669 }
 0x31b   :  { %2418 = vmatpush3.bf16.msra.mxu0 %v1454_v51  ;;  %2419 = vmatprep.mubr.msk.bf16.mxu0 %vm2731_vm0, %v2730_v0  ;;  %v603_v11 = vpack.c.bf16 %v593_v25, %v593_v25  ;;  %v946_v10 = vmul.f32 %v2670_v21, %v3099_v5 }
 0x31c   :  { %2429 = vmatprep.subr.bf16.mxu0 %v2730_v0  ;;  %v605_v45 = vpack.c.bf16 %v595_v44, %v595_v44 }
 0x31d   :  { %v956_v18 = vpack.c.bf16 %v946_v10, %v946_v10 }
 0x322   :  { %2420 = vmatmul.mubr.msk.bf16.vlgmr.msra.gmra.mrb[12].mxu0 %vm488_vm5, %v599_v26 }
 0x323   :  { %2430 = vmatpush3.bf16.msra.mxu0 %v1546_v3  ;;  %2431 = vmatprep.mubr.msk.bf16.mxu0 %vm2731_vm0, %v2730_v0 }
 0x324   :  { %2441 = vmatprep.subr.bf16.mxu0 %v2730_v0 }
 0x32a   :  { %2432 = vmatmul.mubr.msk.bf16.vlgmr.msra.gmra.mrb[16].mxu0 %vm488_vm5, %v601_v46 }
 0x32b   :  { %2442 = vmatpush3.bf16.msra.mxu0 %v1638_v37  ;;  %2443 = vmatprep.mubr.msk.bf16.mxu0 %vm2731_vm0, %v2730_v0 }
 0x32c   :  { %2453 = vmatprep.subr.bf16.mxu0 %v2730_v0 }
 0x332   :  { %2444 = vmatmul.mubr.msk.bf16.vlgmr.msra.gmra.mrb[20].mxu0 %vm488_vm5, %v603_v11 }
 0x333   :  { %2454 = vmatpush3.bf16.msra.mxu0 %v1730_v43  ;;  %2455 = vmatprep.mubr.msk.bf16.mxu0 %vm2731_vm0, %v2730_v0 }
 0x334   :  { %2465 = vmatprep.subr.bf16.mxu0 %v2730_v0 }
 0x33a   :  { %2456 = vmatmul.mubr.msk.bf16.vlgmr.msra.gmra.mrb[24].mxu0 %vm488_vm5, %v605_v45 }
 0x33b   :  { %2466 = vmatpush3.bf16.msra.mxu0 %v1822_v42  ;;  %2467 = vmatprep.mubr.msk.bf16.mxu0 %vm2731_vm0, %v2730_v0 }
 0x33c   :  { %2477 = vmatprep.subr.bf16.mxu0 %v2730_v0 }
 0x33f   :  { %v928_v24 = vpop.xlane.xlu1 %927  ;;  %v560_v32 = vpop.xlane.xlu0 %559 }
 0x340   :  { %2671 = vrcp.f32 %v928_v24 }
 0x343   :  { %v1305_v54 = vpop.permute.xlu1 %1304  ;;  %v575_v57 = vpop.xlane.xlu0 %574 }
 0x344   :  { %v1310_v53 = vsel %vm965_vm2, %v1305_v54, 0  ;;  %2673 = vrcp.f32 %v575_v57 }
 0x345   :  { %2675 = vrcp.f32 %v554_v27  ;;  %2400 = vmatpush3.bf16.msra.mxu1 %v1310_v53 }
 0x346   :  { %2411 = vmatprep.subr.bf16.mxu1 %v2730_v0  ;;  %2677 = vrcp.f32 %v560_v32 }
 0x347   :  { %v1403_v41 = vpop.permute.xlu0 %1402 }
 0x348   :  { %v1408_v22 = vsel %vm965_vm2, %v1403_v41, 0  ;;  %2402 = vmatmul.mubr.msk.bf16.vlgmr.msra.gmra.mrb[40].mxu1 %vm488_vm5, %v956_v18 }
 0x349   :  { %2412 = vmatpush3.bf16.msra.mxu1 %v1408_v22  ;;  %2413 = vmatprep.mubr.msk.bf16.mxu1 %vm2731_vm0, %v2730_v0  ;;  %v3343_v22 = vld [vmem:[%s3445_s4] ss:$0 sm:$0xff] }
 0x34a   :  { %v2672_v5 = vpop.eup %2671  ;;  %2423 = vmatprep.subr.bf16.mxu1 %v2730_v0 }
 0x34b   :  { %v948_v55 = vmul.f32 %v2672_v5, %v3129_v8 }
 0x34d   :  { %v958_v36 = vpack.c.bf16 %v948_v55, %v948_v55 }
 0x34e   :  { %v2674_v9 = vpop.eup %2673 }
 0x34f   :  { %v2676_v62 = vpop.eup %2675  ;;  %v597_v7 = vmul.f32 %v2674_v9, %v3135_v59 }
 0x350   :  { %2414 = vmatmul.mubr.msk.bf16.vlgmr.msra.gmra.mrb[44].mxu1 %vm488_vm5, %v958_v36  ;;  %v590_v8 = vmul.f32 %v2676_v62, %v3103_v40  ;;  %v2678_v63 = vpop.eup %2677 }
 0x351   :  { %2424 = vmatpush3.bf16.msra.mxu1 %v1500_v35  ;;  %v607_v28 = vpack.c.bf16 %v597_v7, %v597_v7  ;;  %2425 = vmatprep.mubr.msk.bf16.mxu1 %vm2731_vm0, %v2730_v0  ;;  %v592_v40 = vmul.f32 %v2678_v63, %v3127_v58  ;;  %v2726_v58 = vld [vmem:[%s3442_s0 + $0x8] sm:$0xff]   ;;  %s2737_s0 = smov 32  }
 0x352   :  { %2435 = vmatprep.subr.bf16.mxu1 %v2730_v0  ;;  %v600_v59 = vpack.c.bf16 %v590_v8, %v590_v8 }
 0x353   :  { %2468 = vmatmul.mubr.msk.bf16.vlgmr.msra.gmra.mrb[28].mxu0 %vm488_vm5, %v607_v28  ;;  %v602_v48 = vpack.c.bf16 %v592_v40, %v592_v40 }
 0x354   :  { %2478 = vmatpush3.bf16.msra.mxu0 %v2603_v2  ;;  %2481 = vmatprep.mubr.msk.bf16.mxu0 %vm2731_vm0, %v2730_v0 }
 0x355   :  { %2479 = vmatprep.subr.bf16.mxu0 %v2730_v0 }
 0x358   :  { %2426 = vmatmul.mubr.msk.bf16.vlgmr.msra.gmra.mrb[28].mxu1 %vm488_vm5, %v600_v59  ;;  %2480 = vmatpush3.bf16.msra.mxu0 %v2604_v47 }
 0x359   :  { %2436 = vmatpush3.bf16.msra.mxu1 %v1592_v1  ;;  %2437 = vmatprep.mubr.msk.bf16.mxu1 %vm2731_vm0, %v2730_v0 }
 0x35a   :  { %2447 = vmatprep.subr.bf16.mxu1 %v2730_v0 }
 0x35b   :  { %2482 = vmatmul.mubr.msk.bf16.vlgmr.msra.gmra.mrb[32].mxu0 %vm72_vm1, %v2725_v56 }
 0x35c   :  { %2485 = vmatprep.mubr.msk.bf16.mxu0 %vm2731_vm0, %v2730_v0 }
 0x360   :  { %2438 = vmatmul.mubr.msk.bf16.vlgmr.msra.gmra.mrb[32].mxu1 %vm488_vm5, %v602_v48 }
 0x361   :  { %2448 = vmatpush3.bf16.msra.mxu1 %v1684_v12  ;;  %2449 = vmatprep.mubr.msk.bf16.mxu1 %vm2731_vm0, %v2730_v0 }
 0x362   :  { %2459 = vmatprep.subr.bf16.mxu1 %v2730_v0 }
 0x363   :  { %2486 = vmatmul.mubr.msk.bf16.gmra.mrb[36].mxu0 %vm72_vm1, %v2726_v58 }
 0x364   :  { %2489 = vmatprep.mubr.msk.bf16.mxu0 %vm2731_vm0, %v2730_v0 }
 0x36b   :  { %2490 = vmatmul.mubr.msk.bf16.gmra.mrb[40].mxu0 %vm72_vm1, %v2727_v31 }
 0x36c   :  { %2493 = vmatprep.mubr.msk.bf16.mxu0 %vm2731_vm0, %v2730_v0 }
 0x373   :  { %2494 = vmatmul.mubr.msk.bf16.gmra.mrb[44].mxu0 %vm72_vm1, %v2728_v13 }
 0x374   :  { %v566_v30 = vpop.xlane.xlu1 %565  ;;  %2497 = vmatprep.mubr.msk.bf16.mxu0 %vm2731_vm0, %v2730_v0 }
 0x375   :  { %2679 = vrcp.f32 %v566_v30 }
 0x378   :  { %v572_v16 = vpop.xlane.xlu0 %571  ;;  %v578_v61 = vpop.xlane.xlu1 %577 }
 0x379   :  { %2681 = vrcp.f32 %v572_v16 }
 0x37a   :  { %2683 = vrcp.f32 %v578_v61 }
 0x37b   :  { %2498 = vmatmul.mubr.msk.bf16.gmra.mrb[48].mxu0 %vm72_vm1, %v2729_v60 }
 0x37f   :  { %v2680_v39 = vpop.eup %2679 }
 0x380   :  { %v594_v49 = vmul.f32 %v2680_v39, %v3185_v15  ;;  %v1868_v15 = vsel %vm965_vm2, %v3161_v52, 0 }
 0x382   :  { %v604_v20 = vpack.c.bf16 %v594_v49, %v594_v49 }
 0x383   :  { %v2682_v38 = vpop.eup %2681 }
 0x384   :  { %2450 = vmatmul.mubr.msk.bf16.vlgmr.msra.gmra.mrb[36].mxu1 %vm488_vm5, %v604_v20  ;;  %v596_v51 = vmul.f32 %v2682_v38, %v3193_v6  ;;  %v2684_v27 = vpop.eup %2683 }
 0x385   :  { %2460 = vmatpush3.bf16.msra.mxu1 %v1776_v50  ;;  %2461 = vmatprep.mubr.msk.bf16.mxu1 %vm2731_vm0, %v2730_v0  ;;  %v598_v23 = vmul.f32 %v2684_v27, %v3197_v34 }
 0x386   :  { %2471 = vmatprep.subr.bf16.mxu1 %v2730_v0  ;;  %v606_v17 = vpack.c.bf16 %v596_v51, %v596_v51 }
 0x387   :  { %v608_v26 = vpack.c.bf16 %v598_v23, %v598_v23 }
 0x38c   :  { %2462 = vmatmul.mubr.msk.bf16.vlgmr.msra.gmra.mrb[40].mxu1 %vm488_vm5, %v606_v17 }
 0x38d   :  { %2472 = vmatpush3.bf16.msra.mxu1 %v1868_v15  ;;  %2473 = vmatprep.mubr.msk.bf16.mxu1 %vm2731_vm0, %v2730_v0  ;;  %vm2176_vm0 = vcmask 523264  }
 0x394   :  { %2474 = vmatmul.mubr.msk.bf16.vlgmr.msra.gmra.mrb[44].mxu1 %vm488_vm5, %v608_v26 }
 0x3f5   :  { %v1490_v29 = vpop.f32.mrb[12].mxu0 }
 0x3f6   :  { %v1910_v6 = vmul.f32 0.5, %v1490_v29  ;;  %v2421_v3 = vpop.f32.mrb[13].mxu0 }
 0x3f7   :  { %v1493_v14 = vpop.f32.mrb[14].mxu0 }
 0x3f8   :  { %2136 = vrot.lane.b32.xlu1 %v1910_v6, %s2737_s0  ;;  %v2422_v33 = vpop.f32.mrb[15].mxu0 }
 0x3fd   :  { %v1582_v52 = vpop.f32.mrb[16].mxu0 }
 0x3fe   :  { %v1912_v46 = vmul.f32 0.5, %v1582_v52  ;;  %v2433_v19 = vpop.f32.mrb[17].mxu0 }
 0x3ff   :  { %v1585_v37 = vpop.f32.mrb[18].mxu0 }
 0x400   :  { %2140 = vrot.lane.b32.xlu1 %v1912_v46, %s2737_s0  ;;  %v2434_v0 = vpop.f32.mrb[19].mxu0 }
 0x405   :  { %v1674_v25 = vpop.f32.mrb[20].mxu0 }
 0x406   :  { %v1914_v34 = vmul.f32 0.5, %v1674_v25  ;;  %v2445_v11 = vpop.f32.mrb[21].mxu0 }
 0x407   :  { %v1677_v4 = vpop.f32.mrb[22].mxu0 }
 0x408   :  { %2144 = vrot.lane.b32.xlu1 %v1914_v34, %s2737_s0  ;;  %v2446_v43 = vpop.f32.mrb[23].mxu0 }
 0x40d   :  { %v1766_v44 = vpop.f32.mrb[24].mxu0 }
 0x40e   :  { %v1916_v45 = vmul.f32 0.5, %v1766_v44  ;;  %v2457_v42 = vpop.f32.mrb[25].mxu0 }
 0x40f   :  { %v1769_v21 = vpop.f32.mrb[26].mxu0 }
 0x410   :  { %2148 = vrot.lane.b32.xlu1 %v1916_v45, %s2737_s0  ;;  %v2458_v24 = vpop.f32.mrb[27].mxu0 }
 0x426   :  { %v1858_v32 = vpop.f32.mrb[28].mxu0 }
 0x427   :  { %v2469_v10 = vpop.f32.mrb[29].mxu0  ;;  %v1918_v23 = vmul.f32 0.5, %v1858_v32 }
 0x428   :  { %v1861_v54 = vpop.f32.mrb[30].mxu0 }
 0x429   :  { %v2470_v57 = vpop.f32.mrb[31].mxu0 }
 0x42b   :  { %v1536_v53 = vpop.f32.mrb[28].mxu1 }
 0x42c   :  { %v1911_v18 = vmul.f32 0.5, %v1536_v53  ;;  %v2427_v41 = vpop.f32.mrb[29].mxu1 }
 0x42d   :  { %v1539_v5 = vpop.f32.mrb[30].mxu1 }
 0x42e   :  { %2138 = vrot.lane.b32.xlu0 %v1911_v18, %s2737_s0  ;;  %v2428_v55 = vpop.f32.mrb[31].mxu1  ;;  %v1977_v36 = vpop.f32.mrb[32].mxu0 }
 0x42f   :  { %v3347_v9 = vadd.f32 %v3343_v22, %v1977_v36  ;;  %v2483_v62 = vpop.f32.mrb[33].mxu0 }
 0x430   :  { %v1980_v7 = vpop.f32.mrb[34].mxu0 }
 0x431   :  { %2086 = vrot.lane.b32.xlu1 %v3347_v9, %s2734_s9  ;;  %v2484_v35 = vpop.f32.mrb[35].mxu0  ;;  %v3371_v0 = vadd.f32 %v3343_v22, %v1980_v7  ;;  %v2238_v42 = vmul.f32 -1.442695, %v3347_v9 }
 0x433   :  { %v1628_v2 = vpop.f32.mrb[32].mxu1  ;;  %2685 = vpow2.f32 %v2238_v42 }
 0x434   :  { %v1913_v28 = vmul.f32 0.5, %v1628_v2  ;;  %v2439_v8 = vpop.f32.mrb[33].mxu1 }
 0x435   :  { %v1631_v47 = vpop.f32.mrb[34].mxu1 }
 0x436   :  { %2142 = vrot.lane.b32.xlu0 %v1913_v28, %s2737_s0  ;;  %v2440_v59 = vpop.f32.mrb[35].mxu1  ;;  %v1985_v63 = vpop.f32.mrb[36].mxu0 }
 0x437   :  { %v1986_v1 = vadd.f32 %v3343_v22, %v1985_v63  ;;  %v2487_v40 = vpop.f32.mrb[37].mxu0 }
 0x438   :  { %v1988_v56 = vpop.f32.mrb[38].mxu0 }
 0x439   :  { %2090 = vrot.lane.b32.xlu1 %v1986_v1, %s2734_s9  ;;  %v1989_v48 = vadd.f32 %v3343_v22, %v1988_v56  ;;  %v2488_v12 = vpop.f32.mrb[39].mxu0  ;;  %v2240_v21 = vmul.f32 -1.442695, %v1986_v1 }
 0x43b   :  { %2687 = vpow2.f32 %v2240_v21  ;;  %v2241_v24 = vmul.f32 -1.442695, %v1989_v48 }
 0x43d   :  { %2092 = vrot.lane.b32.xlu1 %v1989_v48, %s2734_s9  ;;  %v2686_v32 = vpop.eup %2685  ;;  %2689 = vpow2.f32 %v2241_v24 }
 0x43e   :  { %v1993_v58 = vpop.f32.mrb[40].mxu0  ;;  %v2046_v57 = vadd.f32 1.0, %v2686_v32 }
 0x43f   :  { %v1994_v31 = vadd.f32 %v3343_v22, %v1993_v58  ;;  %v2491_v13 = vpop.f32.mrb[41].mxu0 }
 0x440   :  { %v1996_v30 = vpop.f32.mrb[42].mxu0 }
 0x441   :  { %2094 = vrot.lane.b32.xlu1 %v1994_v31, %s2734_s9  ;;  %v3359_v16 = vadd.f32 %v3343_v22, %v1996_v30  ;;  %v2492_v60 = vpop.f32.mrb[43].mxu0  ;;  %v2242_v54 = vmul.f32 -1.442695, %v1994_v31 }
 0x443   :  { %2691 = vpow2.f32 %v2242_v54  ;;  %v2243_v1 = vmul.f32 -1.442695, %v3359_v16 }
 0x444   :  { %2693 = vrcp.f32 %v2046_v57 }
 0x445   :  { %2096 = vrot.lane.b32.xlu1 %v3359_v16, %s2734_s9  ;;  %v2688_v18 = vpop.eup %2687 }
 0x446   :  { %v2001_v61 = vpop.f32.mrb[44].mxu0  ;;  %v2048_v5 = vadd.f32 1.0, %v2688_v18 }
 0x447   :  { %v2002_v39 = vadd.f32 %v3343_v22, %v2001_v61  ;;  %v2495_v49 = vpop.f32.mrb[45].mxu0  ;;  %v2690_v55 = vpop.eup %2689 }
 0x448   :  { %v2004_v20 = vpop.f32.mrb[46].mxu0  ;;  %v2049_v9 = vadd.f32 1.0, %v2690_v55 }
 0x449   :  { %2098 = vrot.lane.b32.xlu1 %v2002_v39, %s2734_s9  ;;  %v2496_v38 = vpop.f32.mrb[47].mxu0  ;;  %v3376_v34 = vadd.f32 %v3343_v22, %v2004_v20 }
 0x44d   :  { %v2692_v62 = vpop.eup %2691 }
 0x44e   :  { %v2009_v50 = vpop.f32.mrb[48].mxu0  ;;  %v2694_v7 = vpop.eup %2693  ;;  %v2050_v28 = vadd.f32 1.0, %v2692_v62 }
 0x44f   :  { %v2010_v51 = vadd.f32 %v3343_v22, %v2009_v50  ;;  %v2499_v17 = vpop.f32.mrb[49].mxu0 }
 0x450   :  { %v2012_v27 = vpop.f32.mrb[50].mxu0 }
 0x451   :  { %2102 = vrot.lane.b32.xlu1 %v2010_v51, %s2734_s9  ;;  %v2500_v15 = vpop.f32.mrb[51].mxu0  ;;  %v3381_v44 = vadd.f32 %v3343_v22, %v2012_v27  ;;  %v2244_v22 = vmul.f32 -1.442695, %v2002_v39  ;;  %v2246_v8 = vmul.f32 -1.442695, %v2010_v51 }
 0x452   :  { %v2239_v27 = vmul.f32 -1.442695, %v3371_v0 }
 0x453   :  { %2695 = vpow2.f32 %v2244_v22 }
 0x454   :  { %2697 = vrcp.f32 %v2048_v5 }
 0x455   :  { %2152 = vrot.lane.b32.xlu1 %v1918_v23, %s2737_s0  ;;  %2699 = vrcp.f32 %v2049_v9 }
 0x456   :  { %2701 = vrcp.f32 %v2050_v28 }
 0x457   :  { %v1720_v26 = vpop.f32.mrb[36].mxu1  ;;  %2703 = vpow2.f32 %v2246_v8 }
 0x458   :  { %v1915_v29 = vmul.f32 0.5, %v1720_v26  ;;  %v2451_v6 = vpop.f32.mrb[37].mxu1  ;;  %2705 = vpow2.f32 %v2243_v1 }
 0x459   :  { %v1723_v3 = vpop.f32.mrb[38].mxu1  ;;  %v2245_v6 = vmul.f32 -1.442695, %v3376_v34 }
 0x45a   :  { %2146 = vrot.lane.b32.xlu0 %v1915_v29, %s2737_s0  ;;  %v2452_v14 = vpop.f32.mrb[39].mxu1 }
 0x45b   :  { %v2247_v14 = vmul.f32 -1.442695, %v3381_v44 }
 0x45d   :  { %v2696_v59 = vpop.eup %2695 }
 0x45e   :  { %v2698_v63 = vpop.eup %2697  ;;  %v2052_v48 = vadd.f32 1.0, %v2696_v59 }
 0x45f   :  { %v1812_v33 = vpop.f32.mrb[40].mxu1  ;;  %v2700_v31 = vpop.eup %2699 }
 0x460   :  { %v1917_v52 = vmul.f32 0.5, %v1812_v33  ;;  %v2463_v46 = vpop.f32.mrb[41].mxu1  ;;  %2707 = vrcp.f32 %v2052_v48  ;;  %v2702_v16 = vpop.eup %2701 }
 0x461   :  { %v1815_v19 = vpop.f32.mrb[42].mxu1  ;;  %v2704_v49 = vpop.eup %2703 }
 0x462   :  { %2150 = vrot.lane.b32.xlu0 %v1917_v52, %s2737_s0  ;;  %v2464_v37 = vpop.f32.mrb[43].mxu1  ;;  %v2054_v50 = vadd.f32 1.0, %v2704_v49  ;;  %v2706_v17 = vpop.eup %2705 }
 0x463   :  { %v2051_v26 = vadd.f32 1.0, %v2706_v17 }
 0x464   :  { %2709 = vrcp.f32 %v2054_v50 }
 0x465   :  { %2711 = vpow2.f32 %v2239_v27 }
 0x466   :  { %2088 = vrot.lane.b32.xlu0 %v3371_v0, %s2734_s9  ;;  %2713 = vrcp.f32 %v2051_v26 }
 0x467   :  { %v1904_v25 = vpop.f32.mrb[44].mxu1  ;;  %2715 = vpow2.f32 %v2245_v6 }
 0x468   :  { %v2475_v11 = vpop.f32.mrb[45].mxu1  ;;  %v1919_v45 = vmul.f32 0.5, %v1904_v25  ;;  %2717 = vpow2.f32 %v2247_v14 }
 0x469   :  { %v1907_v4 = vpop.f32.mrb[46].mxu1 }
 0x46a   :  { %v2476_v43 = vpop.f32.mrb[47].mxu1  ;;  %2100 = vrot.lane.b32.xlu0 %v3376_v34, %s2734_s9  ;;  %v2137_v10 = vpop.permute.xlu1 %2136 }
 0x46b   :  { %v2708_v15 = vpop.eup %2707 }
 0x46e   :  { %2104 = vrot.lane.b32.xlu0 %v3381_v44, %s2734_s9  ;;  %v2710_v52 = vpop.eup %2709 }
 0x46f   :  { %v2712_v19 = vpop.eup %2711 }
 0x470   :  { %v2714_v25 = vpop.eup %2713  ;;  %v2047_v34 = vadd.f32 1.0, %v2712_v19 }
 0x471   :  { %v2716_v11 = vpop.eup %2715 }
 0x472   :  { %2154 = vrot.lane.b32.xlu0 %v1919_v45, %s2737_s0  ;;  %v2141_v53 = vpop.permute.xlu1 %2140  ;;  %2719 = vrcp.f32 %v2047_v34  ;;  %v2053_v45 = vadd.f32 1.0, %v2716_v11  ;;  %v2718_v42 = vpop.eup %2717 }
 0x473   :  { %v2055_v21 = vadd.f32 1.0, %v2718_v42 }
 0x474   :  { %2721 = vrcp.f32 %v2053_v45 }
 0x475   :  { %2723 = vrcp.f32 %v2055_v21 }
 0x47a   :  { %v2145_v41 = vpop.permute.xlu1 %2144 }
 0x47c   :  { %v2720_v32 = vpop.eup %2719 }
 0x482   :  { %v2149_v36 = vpop.permute.xlu1 %2148 }
 0x4a0   :  { %v2139_v12 = vpop.permute.xlu0 %2138 }
 0x4a3   :  { %v2087_v35 = vpop.permute.xlu1 %2086 }
 0x4a4   :  { %v2116_v2 = vmul.f32 %v2694_v7, %v2087_v35 }
 0x4a6   :  { %v2166_v47 = vsel %vm72_vm1, %v2116_v2, %v2137_v10 }
 0x4a7   :  { %2177 = vst.msk [vmem:[%s3446_s5] sm:$0xff] %vm2176_vm0, %v2166_v47 }
 0x4a8   :  { %v2143_v60 = vpop.permute.xlu0 %2142 }
 0x4ab   :  { %v2091_v40 = vpop.permute.xlu1 %2090 }
 0x4ac   :  { %v2118_v56 = vmul.f32 %v2698_v63, %v2091_v40 }
 0x4ae   :  { %v2168_v58 = vsel %vm72_vm1, %v2118_v56, %v2141_v53  ;;  %v2722_v53 = vpop.eup %2721 }
 0x4af   :  { %2179 = vst.msk [vmem:[%s3446_s5 + $0x10] sm:$0xff] %vm2176_vm0, %v2168_v58  ;;  %v2093_v13 = vpop.permute.xlu1 %2092  ;;  %v2724_v55 = vpop.eup %2723 }
 0x4b0   :  { %v2119_v30 = vmul.f32 %v2700_v31, %v2093_v13 }
 0x4b2   :  { %v2169_v61 = vsel %vm72_vm1, %v2119_v30, %v2143_v60 }
 0x4b3   :  { %2180 = vst.msk [vmem:[%s3446_s5 + $0x18] sm:$0xff] %vm2176_vm0, %v2169_v61  ;;  %v2095_v39 = vpop.permute.xlu1 %2094 }
 0x4b4   :  { %v2120_v20 = vmul.f32 %v2702_v16, %v2095_v39 }
 0x4b6   :  { %v2170_v38 = vsel %vm72_vm1, %v2120_v20, %v2145_v41 }
 0x4b7   :  { %2181 = vst.msk [vmem:[%s3446_s5 + $0x20] sm:$0xff] %vm2176_vm0, %v2170_v38  ;;  %v2097_v51 = vpop.permute.xlu1 %2096 }
 0x4b8   :  { %v2121_v4 = vmul.f32 %v2714_v25, %v2097_v51 }
 0x4bb   :  { %v2099_v23 = vpop.permute.xlu1 %2098 }
 0x4bc   :  { %v2122_v29 = vmul.f32 %v2708_v15, %v2099_v23 }
 0x4be   :  { %v2172_v3 = vsel %vm72_vm1, %v2122_v29, %v2149_v36 }
 0x4bf   :  { %2183 = vst.msk [vmem:[%s3446_s5 + $0x30] sm:$0xff] %vm2176_vm0, %v2172_v3 }
 0x4c3   :  { %v2103_v33 = vpop.permute.xlu1 %2102 }
 0x4c4   :  { %v2124_v46 = vmul.f32 %v2710_v52, %v2103_v33 }
 0x4c7   :  { %v2153_v37 = vpop.permute.xlu1 %2152 }
 0x4c8   :  { %v2174_v0 = vsel %vm72_vm1, %v2124_v46, %v2153_v37 }
 0x4c9   :  { %2185 = vst.msk [vmem:[%s3446_s5 + $0x40] sm:$0xff] %vm2176_vm0, %v2174_v0 }
 0x4cc   :  { %v2147_v43 = vpop.permute.xlu0 %2146 }
 0x4cd   :  { %v2171_v44 = vsel %vm72_vm1, %v2121_v4, %v2147_v43 }
 0x4ce   :  { %2182 = vst.msk [vmem:[%s3446_s5 + $0x28] sm:$0xff] %vm2176_vm0, %v2171_v44 }
 0x4d4   :  { %v2151_v24 = vpop.permute.xlu0 %2150 }
 0x4d8   :  { %v2089_v10 = vpop.permute.xlu0 %2088 }
 0x4d9   :  { %v2117_v54 = vmul.f32 %v2720_v32, %v2089_v10 }
 0x4db   :  { %v2167_v57 = vsel %vm72_vm1, %v2117_v54, %v2139_v12 }
 0x4dc   :  { %2178 = vst.msk [vmem:[%s3446_s5 + $0x8] sm:$0xff] %vm2176_vm0, %v2167_v57  ;;  %v2101_v18 = vpop.permute.xlu0 %2100 }
 0x4dd   :  { %v2123_v41 = vmul.f32 %v2722_v53, %v2101_v18 }
 0x4df   :  { %v2173_v22 = vsel %vm72_vm1, %v2123_v41, %v2151_v24 }
 0x4e0   :  { %2184 = vst.msk [vmem:[%s3446_s5 + $0x38] sm:$0xff] %vm2176_vm0, %v2173_v22  ;;  %v2105_v5 = vpop.permute.xlu0 %2104 }
 0x4e1   :  { %v2125_v36 = vmul.f32 %v2724_v55, %v2105_v5 }
 0x4e4   :  { %v2155_v9 = vpop.permute.xlu0 %2154 }
 0x4e5   :  { %v2175_v62 = vsel %vm72_vm1, %v2125_v36, %v2155_v9 }
 0x4e6   :  { %2186 = vst.msk [vmem:[%s3446_s5 + $0x48] sm:$0xff] %vm2176_vm0, %v2175_v62 }

</bundles_post_ra>
